<compile_context>
chip_gen: v6e
topology: v6e:2x2x1
jax: 0.10.0
libtpu: 0.0.40
codegen_flags: <defaults>
</compile_context>

<pallas_src>
import functools

import jax
import jax.numpy as jnp
from jax.experimental import pallas as pl
from jax.experimental.pallas import tpu as pltpu


def _round_up(x, m):
    return (x + m - 1) // m * m


def _elu(y):
    # nn.ELU(alpha=1.0): y if y > 0 else exp(y) - 1  (clamp exp arg for safety)
    return jnp.where(y > 0, y, jnp.exp(jnp.minimum(y, 0.0)) - 1.0)


def _conv_stats_kernel(x_ref, w_ref, mask_ref, y_ref, mean_ref, m2_ref,
                       *, KH, KW, Wp, HOWp, inv_count):
    """Conv for one image as KH*KW shifted matmuls on the flattened padded image.

    x_ref:    (1, CI_pad, S_pad)      bf16  padded image, flattened spatial (zero tail)
    w_ref:    (KH*KW, CO_pad, CI_pad) bf16  conv weight, one (CO, CI) slab per tap
    mask_ref: (1, HO*Wp)              f32   1.0 on valid output columns (wo < WO)
    y_ref:    (1, CO_pad, HO*Wp)      bf16  pre-BN conv output (garbage cols kept)
    mean_ref: (1, CO_pad, 1)          f32   per-image per-channel mean (valid cols)
    m2_ref:   (1, CO_pad, 1)          f32   per-image per-channel centered sum of squares
    """
    S = x_ref.shape[-1]                               # Hp*Wp rounded up to 128
    co_pad = w_ref.shape[1]

    # Roll in f32 (32-bit lane rotate is the best-supported path), feed the MXU
    # in bf16, accumulate in f32.
    x32 = x_ref[0].astype(jnp.float32)                # (CI_pad, S)
    acc = jnp.zeros((co_pad, S), jnp.float32)
    for kh in range(KH):                              # static unroll: KH*KW taps
        for kw in range(KW):
            off = kh * Wp + kw
            shifted = x32 if off == 0 else pltpu.roll(x32, S - off, axis=1)
            acc = acc + jnp.dot(w_ref[kh * KW + kw],
                                shifted.astype(jnp.bfloat16),
                                preferred_element_type=jnp.float32)

    y = acc[:, :HOWp]                                 # drop ho >= HO tail columns
    mask = mask_ref[...]                              # (1, HO*Wp)

    # Per-image per-channel BN partials over VALID columns only, mean-centered
    # (every image has the same valid count, so cross-image combining is cheap).
    mean_t = jnp.sum(y * mask, axis=1, keepdims=True) * inv_count   # (CO_pad, 1)
    centered = (y - mean_t) * mask
    m2_t = jnp.sum(centered * centered, axis=1, keepdims=True)      # (CO_pad, 1)

    mean_ref[0] = mean_t
    m2_ref[0] = m2_t
    y_ref[0] = y.astype(y_ref.dtype)                  # bf16 intermediate to HBM


def _bn_act_kernel(y_ref, scale_ref, shift_ref, o_ref, *, WO, with_elu):
    """Per-channel affine (folded BN, or conv bias) + optional ELU; drops the
    garbage width columns so the store is already NCHW-compatible.

    y_ref:     (1, CO_pad, HO, Wp) bf16
    scale_ref: (CO_pad, 1, 1)      f32
    shift_ref: (CO_pad, 1, 1)      f32
    o_ref:     (1, CO_pad, HO, WO) f32
    """
    y = y_ref[0][:, :, :WO].astype(jnp.float32)       # keep epilogue math in f32 (v5e)
    out = y * scale_ref[...] + shift_ref[...]
    if with_elu:
        out = _elu(out)
    o_ref[0] = out.astype(o_ref.dtype)


def conv_block_forward(x_nchw, w, b, gamma, beta, *, stride=1, padding=0,
                       with_bn=True, with_relu=True, eps=1e-5):
    """Equivalent of ConvBlock.forward(x) (train-mode BatchNorm) for NCHW input x."""
    N, CI, H, W = x_nchw.shape
    CO, CI_w, KH, KW = w.shape
    assert CI == CI_w
    if stride != 1:
        # TODO(synk): stride > 1 needs a strided-column gather epilogue (or an
        # im2col fallback); CAW_MASA_STST's ConvBlocks use stride=1.
        raise NotImplementedError("fused ConvBlock kernel supports stride=1 only")
    if b is None:
        b = jnp.zeros((CO,), jnp.float32)

    Hp, Wp = H + 2 * padding, W + 2 * padding
    HO, WO = Hp - KH + 1, Wp - KW + 1
    S = Hp * Wp
    S_pad = _round_up(S, 128)          # lane-aligned rotate width (tail is zeros)
    HOWp = HO * Wp
    n_valid = HO * WO                  # valid spatial positions per image

    CI_pad = _round_up(CI, 8)
    CO_pad = _round_up(CO, 8)

    # ---- XLA-side prep (tiny: one pad/cast of x, weight re-layout, constants).
    xq = jnp.pad(x_nchw, ((0, 0), (0, CI_pad - CI),
                          (padding, padding), (padding, padding)))
    x_flat = jnp.pad(xq.reshape(N, CI_pad, S),
                     ((0, 0), (0, 0), (0, S_pad - S))).astype(jnp.bfloat16)

    wq = jnp.pad(w.astype(jnp.float32),
                 ((0, CO_pad - CO), (0, CI_pad - CI), (0, 0), (0, 0))).astype(jnp.bfloat16)
    w_taps = wq.transpose(2, 3, 0, 1).reshape(KH * KW, CO_pad, CI_pad)

    col = jnp.arange(HOWp, dtype=jnp.int32) % Wp
    mask = (col < WO).astype(jnp.float32).reshape(1, HOWp)

    # Grid over images: N >= 2 keeps both v7x TensorCores busy.
    # TODO(synk): for N == 1 or very large Hp*Wp-vs-VMEM, split the grid over
    # HO row-tiles with a (KH-1)-row halo.
    grid = (N,)
    params = pltpu.CompilerParams(dimension_semantics=("parallel",))

    # ---- Pass 1: conv with in-kernel im2col (rolled slabs) + BN partials.
    kernel1 = functools.partial(_conv_stats_kernel, KH=KH, KW=KW, Wp=Wp,
                                HOWp=HOWp, inv_count=1.0 / n_valid)
    y_pre, mean_t, m2_t = pl.pallas_call(
        kernel1,
        grid=grid,
        in_specs=[pl.BlockSpec((1, CI_pad, S_pad), lambda n: (n, 0, 0)),
                  pl.BlockSpec((KH * KW, CO_pad, CI_pad), lambda n: (0, 0, 0)),
                  pl.BlockSpec((1, HOWp), lambda n: (0, 0))],
        out_specs=[pl.BlockSpec((1, CO_pad, HOWp), lambda n: (n, 0, 0)),
                   pl.BlockSpec((1, CO_pad, 1), lambda n: (n, 0, 0)),
                   pl.BlockSpec((1, CO_pad, 1), lambda n: (n, 0, 0))],
        out_shape=[jax.ShapeDtypeStruct((N, CO_pad, HOWp), jnp.bfloat16),
                   jax.ShapeDtypeStruct((N, CO_pad, 1), jnp.float32),
                   jax.ShapeDtypeStruct((N, CO_pad, 1), jnp.float32)],
        compiler_params=params,
        cost_estimate=pl.CostEstimate(
            flops=2 * N * KH * KW * CO_pad * CI_pad * S_pad,
            transcendentals=0,
            bytes_accessed=(N * (CI_pad * S_pad * 2 + CO_pad * HOWp * 2 + CO_pad * 8)
                            + KH * KW * CO_pad * CI_pad * 2)),
    )(x_flat, w_taps, mask)

    # ---- Fold train-mode batch statistics into one per-channel scale/shift.
    # Parallel-variance combine of per-image (mean, M2) partials.  The conv bias
    # cancels exactly under mean subtraction and is dropped in the BN path.
    gamma_p = jnp.pad(gamma.astype(jnp.float32), (0, CO_pad - CO))
    beta_p = jnp.pad(beta.astype(jnp.float32), (0, CO_pad - CO))
    if with_bn:
        mu = mean_t[:, :, 0]                                 # (N, CO_pad)
        m2 = m2_t[:, :, 0]
        mean = jnp.mean(mu, axis=0)                          # equal counts per image
        var = (jnp.sum(m2, axis=0)
               + n_valid * jnp.sum((mu - mean) ** 2, axis=0)) / (N * n_valid)
        inv = jax.lax.rsqrt(var + eps)
        # NOTE: padded channels have var=0 -> scale = gamma_pad*rsqrt(eps) applied
        # to all-zero rows; harmless, those rows are never returned.
        scale = gamma_p * inv
        shift = beta_p - mean * gamma_p * inv
        # TODO(synk): BatchNorm2d running_mean/running_var buffer updates are a
        # training-time side effect not reflected in the returned tensor.
    else:
        scale = jnp.ones((CO_pad,), jnp.float32)
        shift = jnp.pad(b.astype(jnp.float32), (0, CO_pad - CO))
    scale = scale.reshape(CO_pad, 1, 1)
    shift = shift.reshape(CO_pad, 1, 1)

    # ---- Pass 2: fused affine + ELU, writing compact NCHW-compatible layout.
    # (input_output_aliases was considered but y_pre has a different dtype/shape
    #  than the compact f32 output, so aliasing is not applicable here.)
    kernel2 = functools.partial(_bn_act_kernel, WO=WO, with_elu=with_relu)
    y4 = y_pre.reshape(N, CO_pad, HO, Wp)                    # metadata-only reshape
    out = pl.pallas_call(
        kernel2,
        grid=grid,
        in_specs=[pl.BlockSpec((1, CO_pad, HO, Wp), lambda n: (n, 0, 0, 0)),
                  pl.BlockSpec((CO_pad, 1, 1), lambda n: (0, 0, 0)),
                  pl.BlockSpec((CO_pad, 1, 1), lambda n: (0, 0, 0))],
        out_specs=pl.BlockSpec((1, CO_pad, HO, WO), lambda n: (n, 0, 0, 0)),
        out_shape=jax.ShapeDtypeStruct((N, CO_pad, HO, WO), jnp.float32),
        compiler_params=params,
        cost_estimate=pl.CostEstimate(
            flops=2 * N * CO_pad * HO * WO,
            transcendentals=(N * CO_pad * HO * WO) if with_relu else 0,
            bytes_accessed=N * CO_pad * HO * (Wp * 2 + WO * 4)),
    )(y4, scale, shift)

    # When CO is already a multiple of 8 this is the module output with zero
    # extra data movement; otherwise a cheap leading-dim slice.
    return out if CO_pad == CO else out[:, :CO]


def _reference_forward(x, w, b, gamma, beta, *, stride, padding,
                       with_bn=True, with_relu=True, eps=1e-5):
    """Pure-JAX reference matching ConvBlock.forward (train-mode BatchNorm)."""
    y = jax.lax.conv_general_dilated(
        x, w, window_strides=(stride, stride),
        padding=[(padding, padding), (padding, padding)],
        dimension_numbers=("NCHW", "OIHW", "NCHW"))
    y = y + b.reshape(1, -1, 1, 1)
    if with_bn:
        mean = jnp.mean(y, axis=(0, 2, 3), keepdims=True)
        var = jnp.mean((y - mean) ** 2, axis=(0, 2, 3), keepdims=True)  # biased
        y = (y - mean) * jax.lax.rsqrt(var + eps)
        y = y * gamma.reshape(1, -1, 1, 1) + beta.reshape(1, -1, 1, 1)
    if with_relu:
        y = jax.nn.elu(y)
    return y


if __name__ == "__main__":
    key = jax.random.PRNGKey(0)
    k_x, k_w, k_b = jax.random.split(key, 3)

    # ConvBlock(in_channels=4, out_channels=8, kernel_size=3, stride=1, padding=1, bias=True)
    N, CI, H, W = 2, 4, 16, 16
    CO, KH, KW = 8, 3, 3

    x = jax.random.normal(k_x, (N, CI, H, W), dtype=jnp.float32)

    # Deterministic parameter init (shapes per nn.Conv2d / nn.BatchNorm2d __init__).
    fan_in = CI * KH * KW
    bound = 1.0 / (fan_in ** 0.5)
    w = jax.random.uniform(k_w, (CO, CI, KH, KW), jnp.float32, -bound, bound)
    b = jax.random.uniform(k_b, (CO,), jnp.float32, -bound, bound)
    gamma = jnp.ones((CO,), jnp.float32)   # BatchNorm2d.weight init
    beta = jnp.zeros((CO,), jnp.float32)   # BatchNorm2d.bias init

    fwd = jax.jit(functools.partial(conv_block_forward, stride=1, padding=1,
                                    with_bn=True, with_relu=True))
    out = jax.block_until_ready(fwd(x, w, b, gamma, beta))
    assert out.shape == (N, CO, H, W), out.shape

    ref = _reference_forward(x, w, b, gamma, beta, stride=1, padding=1)
    err = float(jnp.max(jnp.abs(out - ref)))
    assert err < 1e-1, f"max abs error vs reference: {err}"   # bf16 intermediate tol
    print("KERNEL_OK")
</pallas_src>

<mosaic_0001>
module attributes {stable_mosaic.version = 11 : i64} {
  func.func @_conv_stats_kernel(%arg0: i32, %arg1: memref<1x8x384xbf16, #tpu.memory_space<vmem>>, %arg2: memref<9x8x8xbf16, #tpu.memory_space<vmem>>, %arg3: memref<1x288xf32, #tpu.memory_space<vmem>>, %arg4: memref<1x8x288xbf16, #tpu.memory_space<vmem>>, %arg5: memref<1x8x1xf32, #tpu.memory_space<vmem>>, %arg6: memref<1x8x1xf32, #tpu.memory_space<vmem>>) attributes {dimension_semantics = [#tpu.dimension_semantics<parallel>], iteration_bounds = array<i64: 2>, scalar_prefetch = 0 : i64, scratch_operands = 0 : i64, tpu.core_type = #tpu.core_type<tc>, window_params = [{transform_indices = @transform_0, window_bounds = array<i64: 1, 8, 384>}, {pipeline_mode = #tpu.pipeline_mode<synchronous>, transform_indices = @transform_1, window_bounds = array<i64: 9, 8, 8>}, {pipeline_mode = #tpu.pipeline_mode<synchronous>, transform_indices = @transform_2, window_bounds = array<i64: 1, 288>}, {transform_indices = @transform_3, window_bounds = array<i64: 1, 8, 288>}, {transform_indices = @transform_4, window_bounds = array<i64: 1, 8, 1>}, {transform_indices = @transform_5, window_bounds = array<i64: 1, 8, 1>}]} {
    %c0 = arith.constant 0 : index
    %c0_0 = arith.constant 0 : index
    %c0_1 = arith.constant 0 : index
    %0 = vector.load %arg1[%c0, %c0_0, %c0_1] : memref<1x8x384xbf16, #tpu.memory_space<vmem>>, vector<1x8x384xbf16>
    %1 = vector.shape_cast %0 : vector<1x8x384xbf16> to vector<8x384xbf16>
    %2 = arith.extf %1 : vector<8x384xbf16> to vector<8x384xf32>
    %cst = arith.constant 0.000000e+00 : f32
    %3 = vector.broadcast %cst : f32 to vector<8x384xf32>
    %c0_2 = arith.constant 0 : index
    %c0_3 = arith.constant 0 : index
    %c0_4 = arith.constant 0 : index
    %4 = vector.load %arg2[%c0_2, %c0_3, %c0_4] : memref<9x8x8xbf16, #tpu.memory_space<vmem>>, vector<1x8x8xbf16>
    %5 = vector.shape_cast %4 : vector<1x8x8xbf16> to vector<8x8xbf16>
    %6 = arith.truncf %2 : vector<8x384xf32> to vector<8x384xbf16>
    %cst_5 = arith.constant dense<0.000000e+00> : vector<8x384xf32>
    %7 = tpu.matmul %5, %6, %cst_5 {dimension_numbers = #tpu.dot_dimension_numbers<[1], [0], [0], [1], [0, 0, 1, 1], [], []>} : vector<8x8xbf16>, vector<8x384xbf16>, vector<8x384xf32> -> vector<8x384xf32>
    %8 = arith.addf %3, %7 : vector<8x384xf32>
    %c383_i32 = arith.constant 383 : i32
    %9 = tpu.dynamic_rotate %2 by %c383_i32 dim 1 : vector<8x384xf32>, i32 -> vector<8x384xf32>
    %c1 = arith.constant 1 : index
    %c0_6 = arith.constant 0 : index
    %c0_7 = arith.constant 0 : index
    %10 = vector.load %arg2[%c1, %c0_6, %c0_7] : memref<9x8x8xbf16, #tpu.memory_space<vmem>>, vector<1x8x8xbf16>
    %11 = vector.shape_cast %10 : vector<1x8x8xbf16> to vector<8x8xbf16>
    %12 = arith.truncf %9 : vector<8x384xf32> to vector<8x384xbf16>
    %cst_8 = arith.constant dense<0.000000e+00> : vector<8x384xf32>
    %13 = tpu.matmul %11, %12, %cst_8 {dimension_numbers = #tpu.dot_dimension_numbers<[1], [0], [0], [1], [0, 0, 1, 1], [], []>} : vector<8x8xbf16>, vector<8x384xbf16>, vector<8x384xf32> -> vector<8x384xf32>
    %14 = arith.addf %8, %13 : vector<8x384xf32>
    %c382_i32 = arith.constant 382 : i32
    %15 = tpu.dynamic_rotate %2 by %c382_i32 dim 1 : vector<8x384xf32>, i32 -> vector<8x384xf32>
    %c2 = arith.constant 2 : index
    %c0_9 = arith.constant 0 : index
    %c0_10 = arith.constant 0 : index
    %16 = vector.load %arg2[%c2, %c0_9, %c0_10] : memref<9x8x8xbf16, #tpu.memory_space<vmem>>, vector<1x8x8xbf16>
    %17 = vector.shape_cast %16 : vector<1x8x8xbf16> to vector<8x8xbf16>
    %18 = arith.truncf %15 : vector<8x384xf32> to vector<8x384xbf16>
    %cst_11 = arith.constant dense<0.000000e+00> : vector<8x384xf32>
    %19 = tpu.matmul %17, %18, %cst_11 {dimension_numbers = #tpu.dot_dimension_numbers<[1], [0], [0], [1], [0, 0, 1, 1], [], []>} : vector<8x8xbf16>, vector<8x384xbf16>, vector<8x384xf32> -> vector<8x384xf32>
    %20 = arith.addf %14, %19 : vector<8x384xf32>
    %c366_i32 = arith.constant 366 : i32
    %21 = tpu.dynamic_rotate %2 by %c366_i32 dim 1 : vector<8x384xf32>, i32 -> vector<8x384xf32>
    %c3 = arith.constant 3 : index
    %c0_12 = arith.constant 0 : index
    %c0_13 = arith.constant 0 : index
    %22 = vector.load %arg2[%c3, %c0_12, %c0_13] : memref<9x8x8xbf16, #tpu.memory_space<vmem>>, vector<1x8x8xbf16>
    %23 = vector.shape_cast %22 : vector<1x8x8xbf16> to vector<8x8xbf16>
    %24 = arith.truncf %21 : vector<8x384xf32> to vector<8x384xbf16>
    %cst_14 = arith.constant dense<0.000000e+00> : vector<8x384xf32>
    %25 = tpu.matmul %23, %24, %cst_14 {dimension_numbers = #tpu.dot_dimension_numbers<[1], [0], [0], [1], [0, 0, 1, 1], [], []>} : vector<8x8xbf16>, vector<8x384xbf16>, vector<8x384xf32> -> vector<8x384xf32>
    %26 = arith.addf %20, %25 : vector<8x384xf32>
    %c365_i32 = arith.constant 365 : i32
    %27 = tpu.dynamic_rotate %2 by %c365_i32 dim 1 : vector<8x384xf32>, i32 -> vector<8x384xf32>
    %c4 = arith.constant 4 : index
    %c0_15 = arith.constant 0 : index
    %c0_16 = arith.constant 0 : index
    %28 = vector.load %arg2[%c4, %c0_15, %c0_16] : memref<9x8x8xbf16, #tpu.memory_space<vmem>>, vector<1x8x8xbf16>
    %29 = vector.shape_cast %28 : vector<1x8x8xbf16> to vector<8x8xbf16>
    %30 = arith.truncf %27 : vector<8x384xf32> to vector<8x384xbf16>
    %cst_17 = arith.constant dense<0.000000e+00> : vector<8x384xf32>
    %31 = tpu.matmul %29, %30, %cst_17 {dimension_numbers = #tpu.dot_dimension_numbers<[1], [0], [0], [1], [0, 0, 1, 1], [], []>} : vector<8x8xbf16>, vector<8x384xbf16>, vector<8x384xf32> -> vector<8x384xf32>
    %32 = arith.addf %26, %31 : vector<8x384xf32>
    %c364_i32 = arith.constant 364 : i32
    %33 = tpu.dynamic_rotate %2 by %c364_i32 dim 1 : vector<8x384xf32>, i32 -> vector<8x384xf32>
    %c5 = arith.constant 5 : index
    %c0_18 = arith.constant 0 : index
    %c0_19 = arith.constant 0 : index
    %34 = vector.load %arg2[%c5, %c0_18, %c0_19] : memref<9x8x8xbf16, #tpu.memory_space<vmem>>, vector<1x8x8xbf16>
    %35 = vector.shape_cast %34 : vector<1x8x8xbf16> to vector<8x8xbf16>
    %36 = arith.truncf %33 : vector<8x384xf32> to vector<8x384xbf16>
    %cst_20 = arith.constant dense<0.000000e+00> : vector<8x384xf32>
    %37 = tpu.matmul %35, %36, %cst_20 {dimension_numbers = #tpu.dot_dimension_numbers<[1], [0], [0], [1], [0, 0, 1, 1], [], []>} : vector<8x8xbf16>, vector<8x384xbf16>, vector<8x384xf32> -> vector<8x384xf32>
    %38 = arith.addf %32, %37 : vector<8x384xf32>
    %c348_i32 = arith.constant 348 : i32
    %39 = tpu.dynamic_rotate %2 by %c348_i32 dim 1 : vector<8x384xf32>, i32 -> vector<8x384xf32>
    %c6 = arith.constant 6 : index
    %c0_21 = arith.constant 0 : index
    %c0_22 = arith.constant 0 : index
    %40 = vector.load %arg2[%c6, %c0_21, %c0_22] : memref<9x8x8xbf16, #tpu.memory_space<vmem>>, vector<1x8x8xbf16>
    %41 = vector.shape_cast %40 : vector<1x8x8xbf16> to vector<8x8xbf16>
    %42 = arith.truncf %39 : vector<8x384xf32> to vector<8x384xbf16>
    %cst_23 = arith.constant dense<0.000000e+00> : vector<8x384xf32>
    %43 = tpu.matmul %41, %42, %cst_23 {dimension_numbers = #tpu.dot_dimension_numbers<[1], [0], [0], [1], [0, 0, 1, 1], [], []>} : vector<8x8xbf16>, vector<8x384xbf16>, vector<8x384xf32> -> vector<8x384xf32>
    %44 = arith.addf %38, %43 : vector<8x384xf32>
    %c347_i32 = arith.constant 347 : i32
    %45 = tpu.dynamic_rotate %2 by %c347_i32 dim 1 : vector<8x384xf32>, i32 -> vector<8x384xf32>
    %c7 = arith.constant 7 : index
    %c0_24 = arith.constant 0 : index
    %c0_25 = arith.constant 0 : index
    %46 = vector.load %arg2[%c7, %c0_24, %c0_25] : memref<9x8x8xbf16, #tpu.memory_space<vmem>>, vector<1x8x8xbf16>
    %47 = vector.shape_cast %46 : vector<1x8x8xbf16> to vector<8x8xbf16>
    %48 = arith.truncf %45 : vector<8x384xf32> to vector<8x384xbf16>
    %cst_26 = arith.constant dense<0.000000e+00> : vector<8x384xf32>
    %49 = tpu.matmul %47, %48, %cst_26 {dimension_numbers = #tpu.dot_dimension_numbers<[1], [0], [0], [1], [0, 0, 1, 1], [], []>} : vector<8x8xbf16>, vector<8x384xbf16>, vector<8x384xf32> -> vector<8x384xf32>
    %50 = arith.addf %44, %49 : vector<8x384xf32>
    %c346_i32 = arith.constant 346 : i32
    %51 = tpu.dynamic_rotate %2 by %c346_i32 dim 1 : vector<8x384xf32>, i32 -> vector<8x384xf32>
    %c8 = arith.constant 8 : index
    %c0_27 = arith.constant 0 : index
    %c0_28 = arith.constant 0 : index
    %52 = vector.load %arg2[%c8, %c0_27, %c0_28] : memref<9x8x8xbf16, #tpu.memory_space<vmem>>, vector<1x8x8xbf16>
    %53 = vector.shape_cast %52 : vector<1x8x8xbf16> to vector<8x8xbf16>
    %54 = arith.truncf %51 : vector<8x384xf32> to vector<8x384xbf16>
    %cst_29 = arith.constant dense<0.000000e+00> : vector<8x384xf32>
    %55 = tpu.matmul %53, %54, %cst_29 {dimension_numbers = #tpu.dot_dimension_numbers<[1], [0], [0], [1], [0, 0, 1, 1], [], []>} : vector<8x8xbf16>, vector<8x384xbf16>, vector<8x384xf32> -> vector<8x384xf32>
    %56 = arith.addf %50, %55 : vector<8x384xf32>
    %57 = vector.extract_strided_slice %56 {offsets = [0, 0], sizes = [8, 288], strides = [1, 1]} : vector<8x384xf32> to vector<8x288xf32>
    %c0_30 = arith.constant 0 : index
    %c0_31 = arith.constant 0 : index
    %58 = vector.load %arg3[%c0_30, %c0_31] : memref<1x288xf32, #tpu.memory_space<vmem>>, vector<1x288xf32>
    %59 = vector.broadcast %58 : vector<1x288xf32> to vector<8x288xf32>
    %60 = arith.mulf %57, %59 : vector<8x288xf32>
    %cst_32 = arith.constant dense<0.000000e+00> : vector<8xf32>
    %61 = vector.multi_reduction <add>, %60, %cst_32 [1] : vector<8x288xf32> to vector<8xf32>
    %62 = vector.shape_cast %61 : vector<8xf32> to vector<8x1xf32>
    %cst_33 = arith.constant 3.906250e-03 : f32
    %63 = vector.broadcast %cst_33 : f32 to vector<8x1xf32>
    %64 = arith.mulf %62, %63 : vector<8x1xf32>
    %65 = vector.broadcast %64 : vector<8x1xf32> to vector<8x288xf32>
    %66 = arith.subf %57, %65 : vector<8x288xf32>
    %67 = vector.broadcast %58 : vector<1x288xf32> to vector<8x288xf32>
    %68 = arith.mulf %66, %67 : vector<8x288xf32>
    %69 = arith.mulf %68, %68 : vector<8x288xf32>
    %cst_34 = arith.constant dense<0.000000e+00> : vector<8xf32>
    %70 = vector.multi_reduction <add>, %69, %cst_34 [1] : vector<8x288xf32> to vector<8xf32>
    %71 = vector.shape_cast %70 : vector<8xf32> to vector<8x1xf32>
    %c0_35 = arith.constant 0 : index
    %c0_36 = arith.constant 0 : index
    %c0_37 = arith.constant 0 : index
    %72 = vector.load %arg5[%c0_35, %c0_36, %c0_37] : memref<1x8x1xf32, #tpu.memory_space<vmem>>, vector<1x8x1xf32>
    %73 = vector.shape_cast %72 : vector<1x8x1xf32> to vector<8x1xf32>
    %74 = vector.shape_cast %64 : vector<8x1xf32> to vector<1x8x1xf32>
    tpu.vector_store %arg5[%c0_35, %c0_36, %c0_37], %74 {strides = array<i32>} : memref<1x8x1xf32, #tpu.memory_space<vmem>>, vector<1x8x1xf32>,
    %c0_38 = arith.constant 0 : index
    %c0_39 = arith.constant 0 : index
    %c0_40 = arith.constant 0 : index
    %75 = vector.load %arg6[%c0_38, %c0_39, %c0_40] : memref<1x8x1xf32, #tpu.memory_space<vmem>>, vector<1x8x1xf32>
    %76 = vector.shape_cast %75 : vector<1x8x1xf32> to vector<8x1xf32>
    %77 = vector.shape_cast %71 : vector<8x1xf32> to vector<1x8x1xf32>
    tpu.vector_store %arg6[%c0_38, %c0_39, %c0_40], %77 {strides = array<i32>} : memref<1x8x1xf32, #tpu.memory_space<vmem>>, vector<1x8x1xf32>,
    %78 = arith.truncf %57 : vector<8x288xf32> to vector<8x288xbf16>
    %c0_41 = arith.constant 0 : index
    %c0_42 = arith.constant 0 : index
    %c0_43 = arith.constant 0 : index
    %79 = vector.load %arg4[%c0_41, %c0_42, %c0_43] : memref<1x8x288xbf16, #tpu.memory_space<vmem>>, vector<1x8x288xbf16>
    %80 = vector.shape_cast %79 : vector<1x8x288xbf16> to vector<8x288xbf16>
    %81 = vector.shape_cast %78 : vector<8x288xbf16> to vector<1x8x288xbf16>
    tpu.vector_store %arg4[%c0_41, %c0_42, %c0_43], %81 {strides = array<i32>} : memref<1x8x288xbf16, #tpu.memory_space<vmem>>, vector<1x8x288xbf16>,
    return
  }
  func.func @transform_0(%arg0: i32) -> (i32, i32, i32) {
    %c0_i32 = arith.constant 0 : i32
    %c0_i32_0 = arith.constant 0 : i32
    %c0_i32_1 = arith.constant 0 : i32
    return %arg0, %c0_i32, %c0_i32_0 : i32, i32, i32
  }
  func.func @transform_1(%arg0: i32) -> (i32, i32, i32) {
    %c0_i32 = arith.constant 0 : i32
    %c0_i32_0 = arith.constant 0 : i32
    %c0_i32_1 = arith.constant 0 : i32
    %c0_i32_2 = arith.constant 0 : i32
    return %c0_i32, %c0_i32_0, %c0_i32_1 : i32, i32, i32
  }
  func.func @transform_2(%arg0: i32) -> (i32, i32) {
    %c0_i32 = arith.constant 0 : i32
    %c0_i32_0 = arith.constant 0 : i32
    %c0_i32_1 = arith.constant 0 : i32
    return %c0_i32, %c0_i32_0 : i32, i32
  }
  func.func @transform_3(%arg0: i32) -> (i32, i32, i32) {
    %c0_i32 = arith.constant 0 : i32
    %c0_i32_0 = arith.constant 0 : i32
    %c0_i32_1 = arith.constant 0 : i32
    return %arg0, %c0_i32, %c0_i32_0 : i32, i32, i32
  }
  func.func @transform_4(%arg0: i32) -> (i32, i32, i32) {
    %c0_i32 = arith.constant 0 : i32
    %c0_i32_0 = arith.constant 0 : i32
    %c0_i32_1 = arith.constant 0 : i32
    return %arg0, %c0_i32, %c0_i32_0 : i32, i32, i32
  }
  func.func @transform_5(%arg0: i32) -> (i32, i32, i32) {
    %c0_i32 = arith.constant 0 : i32
    %c0_i32_0 = arith.constant 0 : i32
    %c0_i32_1 = arith.constant 0 : i32
    return %arg0, %c0_i32, %c0_i32_0 : i32, i32, i32
  }
}

module attributes {stable_mosaic.version = 11 : i64} {
  func.func @_bn_act_kernel(%arg0: i32, %arg1: memref<1x8x16x18xbf16, #tpu.memory_space<vmem>>, %arg2: memref<8x1x1xf32, #tpu.memory_space<vmem>>, %arg3: memref<8x1x1xf32, #tpu.memory_space<vmem>>, %arg4: memref<1x8x16x16xf32, #tpu.memory_space<vmem>>) attributes {dimension_semantics = [#tpu.dimension_semantics<parallel>], iteration_bounds = array<i64: 2>, scalar_prefetch = 0 : i64, scratch_operands = 0 : i64, tpu.core_type = #tpu.core_type<tc>, window_params = [{transform_indices = @transform_0, window_bounds = array<i64: 1, 8, 16, 18>}, {pipeline_mode = #tpu.pipeline_mode<synchronous>, transform_indices = @transform_1, window_bounds = array<i64: 8, 1, 1>}, {pipeline_mode = #tpu.pipeline_mode<synchronous>, transform_indices = @transform_2, window_bounds = array<i64: 8, 1, 1>}, {transform_indices = @transform_3, window_bounds = array<i64: 1, 8, 16, 16>}]} {
    %c0 = arith.constant 0 : index
    %c0_0 = arith.constant 0 : index
    %c0_1 = arith.constant 0 : index
    %c0_2 = arith.constant 0 : index
    %0 = vector.load %arg1[%c0, %c0_0, %c0_1, %c0_2] : memref<1x8x16x18xbf16, #tpu.memory_space<vmem>>, vector<1x8x16x18xbf16>
    %1 = vector.shape_cast %0 : vector<1x8x16x18xbf16> to vector<8x16x18xbf16>
    %2 = vector.extract_strided_slice %1 {offsets = [0, 0, 0], sizes = [8, 16, 16], strides = [1, 1, 1]} : vector<8x16x18xbf16> to vector<8x16x16xbf16>
    %3 = arith.extf %2 : vector<8x16x16xbf16> to vector<8x16x16xf32>
    %c0_3 = arith.constant 0 : index
    %c0_4 = arith.constant 0 : index
    %c0_5 = arith.constant 0 : index
    %4 = vector.load %arg2[%c0_3, %c0_4, %c0_5] : memref<8x1x1xf32, #tpu.memory_space<vmem>>, vector<8x1x1xf32>
    %5 = vector.broadcast %4 : vector<8x1x1xf32> to vector<8x16x16xf32>
    %6 = arith.mulf %3, %5 : vector<8x16x16xf32>
    %c0_6 = arith.constant 0 : index
    %c0_7 = arith.constant 0 : index
    %c0_8 = arith.constant 0 : index
    %7 = vector.load %arg3[%c0_6, %c0_7, %c0_8] : memref<8x1x1xf32, #tpu.memory_space<vmem>>, vector<8x1x1xf32>
    %8 = vector.broadcast %7 : vector<8x1x1xf32> to vector<8x16x16xf32>
    %9 = arith.addf %6, %8 : vector<8x16x16xf32>
    %cst = arith.constant 0.000000e+00 : f32
    %10 = vector.broadcast %cst : f32 to vector<8x16x16xf32>
    %11 = arith.cmpf ogt, %9, %10 : vector<8x16x16xf32>
    %cst_9 = arith.constant 0.000000e+00 : f32
    %12 = vector.broadcast %cst_9 : f32 to vector<8x16x16xf32>
    %13 = arith.minimumf %9, %12 : vector<8x16x16xf32>
    %14 = math.exp %13 : vector<8x16x16xf32>
    %cst_10 = arith.constant 1.000000e+00 : f32
    %15 = vector.broadcast %cst_10 : f32 to vector<8x16x16xf32>
    %16 = arith.subf %14, %15 : vector<8x16x16xf32>
    %17 = arith.select %11, %9, %16 : vector<8x16x16xi1>, vector<8x16x16xf32>
    %c0_11 = arith.constant 0 : index
    %c0_12 = arith.constant 0 : index
    %c0_13 = arith.constant 0 : index
    %c0_14 = arith.constant 0 : index
    %18 = vector.load %arg4[%c0_11, %c0_12, %c0_13, %c0_14] : memref<1x8x16x16xf32, #tpu.memory_space<vmem>>, vector<1x8x16x16xf32>
    %19 = vector.shape_cast %18 : vector<1x8x16x16xf32> to vector<8x16x16xf32>
    %20 = vector.shape_cast %17 : vector<8x16x16xf32> to vector<1x8x16x16xf32>
    tpu.vector_store %arg4[%c0_11, %c0_12, %c0_13, %c0_14], %20 {strides = array<i32>} : memref<1x8x16x16xf32, #tpu.memory_space<vmem>>, vector<1x8x16x16xf32>,
    return
  }
  func.func @transform_0(%arg0: i32) -> (i32, i32, i32, i32) {
    %c0_i32 = arith.constant 0 : i32
    %c0_i32_0 = arith.constant 0 : i32
    %c0_i32_1 = arith.constant 0 : i32
    %c0_i32_2 = arith.constant 0 : i32
    return %arg0, %c0_i32, %c0_i32_0, %c0_i32_1 : i32, i32, i32, i32
  }
  func.func @transform_1(%arg0: i32) -> (i32, i32, i32) {
    %c0_i32 = arith.constant 0 : i32
    %c0_i32_0 = arith.constant 0 : i32
    %c0_i32_1 = arith.constant 0 : i32
    %c0_i32_2 = arith.constant 0 : i32
    return %c0_i32, %c0_i32_0, %c0_i32_1 : i32, i32, i32
  }
  func.func @transform_2(%arg0: i32) -> (i32, i32, i32) {
    %c0_i32 = arith.constant 0 : i32
    %c0_i32_0 = arith.constant 0 : i32
    %c0_i32_1 = arith.constant 0 : i32
    %c0_i32_2 = arith.constant 0 : i32
    return %c0_i32, %c0_i32_0, %c0_i32_1 : i32, i32, i32
  }
  func.func @transform_3(%arg0: i32) -> (i32, i32, i32, i32) {
    %c0_i32 = arith.constant 0 : i32
    %c0_i32_0 = arith.constant 0 : i32
    %c0_i32_1 = arith.constant 0 : i32
    %c0_i32_2 = arith.constant 0 : i32
    return %arg0, %c0_i32, %c0_i32_0, %c0_i32_1 : i32, i32, i32, i32
  }
}

</mosaic_0001>

<bundles_post_ra>
// kernel: conv_block_forward.3
= control target key start
LH: loop header
LB: loop body
LE: loop exit
PB: predicated region body
PF: predicated region fallthrough
CT: control target
= control target key end

     0   :  { %8 = vsyncpa [#allocation3], 0  ;;  %s1110_s0 = inlined_call_operand.vmem [shape: bf16[2,8,16,18], index: 0, kind: input, shape index: {}]   ;;  %s1111_s1 = inlined_call_operand.vmem [shape: f32[8,1,1], index: 1, kind: input, shape index: {}]   ;;  %s1112_s2 = inlined_call_operand.vmem [shape: f32[8,1,1], index: 2, kind: input, shape index: {}]   ;;  %s1113_s3 = inlined_call_operand.hbm [shape: f32[2,8,16,16], index: 3, kind: output, shape index: {}]  }
   0x1   :  { %10 = vsyncpa [#allocation3 + $0x1], 0  ;;  %s829_s12 = smov 0   ;;  %s831_s13 = smov 0  }
   0x2   :  { %s833_s14 = smov 0   ;;  %s835_s15 = smov 0  }
   0x3 LB: > { %s850_s16 = sadd.s32 4294967295, %s803_s15   ;;  %s582_s17 = sadd.s32 4294967294, %s803_s15   ;;  %s803_s15 = sphi %s835_s15, %s1119_s15   ;;  %s799_s14 = sphi %s833_s14, %s1118_s14   ;;  %s795_s13 = sphi %s831_s13, %s1117_s13   ;;  %s791_s12 = sphi %s829_s12, %s1116_s12  }
   0x4   : > { %s854_s18 = sadd.s32 1, %s803_s15   ;;  %s91_s19 = sadd.s32 1, %s799_s14 }
   0x5   : > { %s88_s20 = ssub.s32 %s803_s15, %s854_s18  ;;  %p101_p0 = scmp.ne.s32.totalorder %s799_s14, %s795_s13 }
   0x6   : > { %p89_p1 = scmp.eq.s32.totalorder %s88_s20, 0  ;;  %p102_p2 = scmp.eq.s32.totalorder %s850_s16, 1 }
   0x7   : > { %p107_p3 = scmp.ne.s32.totalorder %s795_s13, %s791_s12  ;;  %p108_p4 = scmp.eq.s32.totalorder %s582_s17, 1 }
   0x8   : > { %s865_s21 = scalar_select %p89_p1, %s799_s14, %s91_s19  }
   0x9   : > { %p867_p5 = por %p102_p2, %p101_p0  ;;  %p871_p6 = por %p108_p4, %p107_p3 }
   0xa   : > { %p585_p7 = scmp.ge.s32.totalorder %s803_s15, 1  ;;  %p140_p8 = scmp.lt.s32.totalorder %s803_s15, 3 }
   0xc   : > { %p141_p9 = pnand %p585_p7, %p140_p8 }
   0xd   : > { %p164_p10 = scmp.lt.s32.totalorder (!%p141_p9), %s850_s16, 1  ;;  %s161_s25 = sand.u32 (!%p141_p9), 1, %s795_s13  }
   0xe   : > { %144 = sbr.rel (%p141_p9) target bundleno = 213 (0xd5), region = 32  ;;  %s586_s26 = sshll.u32 (!%p141_p9), %s161_s25, 7 }
   0xf   : > { %s997_s27 = scalar_lea.vmem (!%p141_p9), [#allocation2], %s586_s26  ;;  %s627_s28 = sshll.u32 (!%p141_p9), %s850_s16, 11 }
  0x10   : > { %s520_s29 = sshll.u32 (!%p141_p9), %s997_s27, 4  ;;  %s1070_s5 = scalar_lea.sflag (!%p141_p9), [#allocation3], %s161_s25  ;;  %s1059_s29 = int_to_ptr.vmem [resolvable:$true] %s520_s29 }
  0x11   : > { %s743_s6 = scalar_lea.vmem (!%p141_p9), %s1059_s29, 2048  ;;  %s806_s7 = smov (!%p141_p9), [#allocation2]  }
  0x12   : > { %p744_p11 = scmp.ne.s32.totalorder (!%p141_p9), %s1059_s29, %s743_s6  ;;  %s747_s8 = sshll.u32 (!%p141_p9), %s806_s7, 4  ;;  %s748_s8 = int_to_ptr.vmem [resolvable:$false] %s747_s8 }
  0x13   : > { %v591_v0 = vld [vmem:[%s1111_s1 + $0x2] ss:$0 sm:$0xff]  ;;  %v589_v1 = vld [vmem:[%s1111_s1] ss:$0 sm:$0xff]  ;;  %v805_v2 = vmov 0   ;;  %s165_s11 = scalar_select %p164_p10, %s850_s16, 1 }
  0x14   : > { %710 = vset.pattern.permute.xlu1 %v805_v2  ;;  %709 = vset.pattern.permute.xlu0 %v805_v2  ;;  %v592_v3 = vld [vmem:[%s1111_s1 + $0x3] ss:$0 sm:$0xff]  ;;  %v590_v4 = vld [vmem:[%s1111_s1 + $0x1] ss:$0 sm:$0xff]  ;;  %v594_v5 = vld [vmem:[%s1111_s1 + $0x5] ss:$0 sm:$0xff]  ;;  %s1057_s16 = scalar_lea.hbm %s1113_s3, %s627_s28  ;;  %p745_p12 = pnand %p744_p11, %p867_p5 }
  0x15   : > { %258 = vperm.xlu1 %710, %v591_v0   ;;  %250 = vperm.xlu0 %709, %v589_v1   ;;  %v593_v6 = vld [vmem:[%s1111_s1 + $0x4] ss:$0 sm:$0xff]  ;;  %v596_v7 = vld [vmem:[%s1111_s1 + $0x7] ss:$0 sm:$0xff]  ;;  %v595_v8 = vld [vmem:[%s1111_s1 + $0x6] ss:$0 sm:$0xff]  ;;  %p750_p0 = scmp.lt.s32.totalorder %s1059_s29, %s748_s8 }
  0x16   : > { %v598_v9 = vld [vmem:[%s1112_s2 + $0x1] ss:$0 sm:$0xff]  ;;  %v597_v10 = vld [vmem:[%s1112_s2] ss:$0 sm:$0xff]  ;;  %v600_v11 = vld [vmem:[%s1112_s2 + $0x3] ss:$0 sm:$0xff]  ;;  %p746_p13 = pneg %p745_p12 }
  0x17   : > { %v599_v12 = vld [vmem:[%s1112_s2 + $0x2] ss:$0 sm:$0xff]  ;;  %v602_v13 = vld [vmem:[%s1112_s2 + $0x5] ss:$0 sm:$0xff]  ;;  %v601_v14 = vld [vmem:[%s1112_s2 + $0x4] ss:$0 sm:$0xff] }
  0x18   : > { %v604_v15 = vld [vmem:[%s1112_s2 + $0x7] ss:$0 sm:$0xff]  ;;  %v603_v16 = vld [vmem:[%s1112_s2 + $0x6] ss:$0 sm:$0xff]  ;;  %s626_s17 = sshll.u32 %s165_s11, 6  ;;  %vm489_vm0 = vcmask 130048  }
  0x19   : > { %262 = vperm.xlu1 %710, %v592_v3   ;;  %254 = vperm.xlu0 %709, %v590_v4   ;;  %s168_s24 = scalar_lea.vmem %s1110_s0, %s626_s17  ;;  %s749_s9 = scalar_lea.vmem %s748_s8, 4096 }
  0x1a   : > { %v629_v21 = vld [vmem:[%s168_s24] sm:$0xff]   ;;  %v660_v22 = vld [vmem:[%s168_s24 + $0x8] sm:$0xff]   ;;  %v661_v25 = vld [vmem:[%s168_s24 + $0x10] sm:$0xff]   ;;  %p751_p1 = scmp.lt.s32.totalorder %s749_s9, %s743_s6 }
  0x1b   : > { %v630_v26 = vunpack.c.l.bf16 %v629_v21  ;;  %v631_v27 = vunpack.c.h.bf16 %v629_v21  ;;  %v662_v28 = vld [vmem:[%s168_s24 + $0x18] sm:$0xff]   ;;  %v634_v29 = vunpack.c.l.bf16 %v660_v22  ;;  %v635_v30 = vunpack.c.h.bf16 %v660_v22  ;;  %v664_v33 = vld [vmem:[%s168_s24 + $0x28] sm:$0xff]   ;;  %v663_v34 = vld [vmem:[%s168_s24 + $0x20] sm:$0xff]  }
  0x1c   : > { %v638_v35 = vunpack.c.l.bf16 %v661_v25  ;;  %v642_v36 = vunpack.c.l.bf16 %v662_v28  ;;  %v643_v37 = vunpack.c.h.bf16 %v662_v28  ;;  %v666_v42 = vld [vmem:[%s168_s24 + $0x38] sm:$0xff]   ;;  %v934_v43 = vld [vmem:[%s168_s24 + $0x30] sm:$0xff]   ;;  %v639_v44 = vunpack.c.h.bf16 %v661_v25  ;;  %p752_p2 = por %p751_p1, %p750_p0 }
  0x1d   : > { %270 = vperm.xlu1 %710, %v594_v5   ;;  %266 = vperm.xlu0 %709, %v593_v6   ;;  %v650_v45 = vunpack.c.l.bf16 %v664_v33  ;;  %v651_v46 = vunpack.c.h.bf16 %v664_v33  ;;  %v646_v47 = vunpack.c.l.bf16 %v663_v34  ;;  %v647_v54 = vunpack.c.h.bf16 %v663_v34 }
  0x1e   : > { %v658_v55 = vunpack.c.l.bf16 %v666_v42  ;;  %v659_v56 = vunpack.c.h.bf16 %v666_v42  ;;  %v654_v57 = vunpack.c.l.bf16 %v934_v43  ;;  %p753_p3 = pnand %p752_p2, %p746_p13 }
  0x21   : > { %278 = vperm.xlu1 %710, %v596_v7   ;;  %274 = vperm.xlu0 %709, %v595_v8  }
  0x25   : > { %350 = vperm.xlu1 %710, %v598_v9   ;;  %346 = vperm.xlu0 %709, %v597_v10  }
  0x29   : > { %358 = vperm.xlu1 %710, %v600_v11   ;;  %354 = vperm.xlu0 %709, %v599_v12  }
  0x2d   : > { %366 = vperm.xlu1 %710, %v602_v13   ;;  %362 = vperm.xlu0 %709, %v601_v14  }
  0x31   : > { %374 = vperm.xlu1 %710, %v604_v15   ;;  %370 = vperm.xlu0 %709, %v603_v16  }
  0x90   : > { %v259_v17 = vpop.permute.xlu1 %258  ;;  %v251_v18 = vpop.permute.xlu0 %250 }
  0x91   : > { %v281_v38 = vmul.f32 %v630_v26, %v251_v18  ;;  %v282_v39 = vmul.f32 %v631_v27, %v251_v18  ;;  %v285_v62 = vmul.f32 %v638_v35, %v259_v17  ;;  %v286_v63 = vmul.f32 %v639_v44, %v259_v17 }
  0x94   : > { %v263_v19 = vpop.permute.xlu1 %262  ;;  %v255_v20 = vpop.permute.xlu0 %254 }
  0x95   : > { %v283_v40 = vmul.f32 %v634_v29, %v255_v20  ;;  %v284_v41 = vmul.f32 %v635_v30, %v255_v20  ;;  %v287_v58 = vmul.f32 %v642_v36, %v263_v19  ;;  %v288_v59 = vmul.f32 %v643_v37, %v263_v19 }
  0x96   : > { %v655_v30 = vunpack.c.h.bf16 %v934_v43 }
  0x98   : > { %v271_v23 = vpop.permute.xlu1 %270  ;;  %v267_v24 = vpop.permute.xlu0 %266 }
  0x99   : > { %v291_v12 = vmul.f32 %v650_v45, %v271_v23  ;;  %v292_v13 = vmul.f32 %v651_v46, %v271_v23  ;;  %v289_v15 = vmul.f32 %v646_v47, %v267_v24  ;;  %v290_v16 = vmul.f32 %v647_v54, %v267_v24 }
  0x9c   : > { %v930_v31 = vpop.permute.xlu1 %278  ;;  %v932_v32 = vpop.permute.xlu0 %274 }
  0x9d   : > { %v295_v29 = vmul.f32 %v658_v55, %v930_v31  ;;  %v296_v35 = vmul.f32 %v659_v56, %v930_v31  ;;  %v294_v45 = vmul.f32 %v655_v30, %v932_v32 }
  0xa0   : > { %v351_v48 = vpop.permute.xlu1 %350  ;;  %v347_v49 = vpop.permute.xlu0 %346 }
  0xa1   : > { %v936_v50 = vadd.f32 %v351_v48, %v283_v40  ;;  %v938_v51 = vadd.f32 %v351_v48, %v284_v41  ;;  %v940_v52 = vadd.f32 %v347_v49, %v281_v38  ;;  %v942_v53 = vadd.f32 %v347_v49, %v282_v39 }
  0xa2   : > { %v293_v41 = vmul.f32 %v654_v57, %v932_v32 }
  0xa3   : > { %v411_v60 = vmin.f32 %v936_v50, 0.0  ;;  %v412_v61 = vmin.f32 %v938_v51, 0.0  ;;  %v409_v0 = vmin.f32 %v940_v52, 0.0  ;;  %v410_v1 = vmin.f32 %v942_v53, 0.0 }
  0xa4   : > { %v359_v2 = vpop.permute.xlu1 %358  ;;  %v355_v3 = vpop.permute.xlu0 %354  ;;  %vm395_vm1 = vcmp.gt.f32.partialorder %v936_v50, 0.0  ;;  %vm396_vm2 = vcmp.gt.f32.partialorder %v938_v51, 0.0  ;;  %vm393_vm3 = vcmp.gt.f32.partialorder %v940_v52, 0.0  ;;  %vm394_vm4 = vcmp.gt.f32.partialorder %v942_v53, 0.0 }
  0xa5   : > { %v429_v4 = vmul.f32 1.442695, %v411_v60  ;;  %v431_v5 = vmul.f32 1.442695, %v412_v61  ;;  %v949_v6 = vadd.f32 %v359_v2, %v287_v58  ;;  %v951_v7 = vadd.f32 %v359_v2, %v288_v59 }
  0xa6   : > { %v425_v8 = vmul.f32 1.442695, %v409_v0  ;;  %v427_v9 = vmul.f32 1.442695, %v410_v1  ;;  %v953_v10 = vadd.f32 %v355_v3, %v285_v62  ;;  %v955_v11 = vadd.f32 %v355_v3, %v286_v63 }
  0xa7   : > { %711 = vpow2.f32 %v429_v4  ;;  %v415_v14 = vmin.f32 %v949_v6, 0.0  ;;  %v416_v17 = vmin.f32 %v951_v7, 0.0  ;;  %vm399_vm5 = vcmp.gt.f32.partialorder %v949_v6, 0.0 }
  0xa8   : > { %713 = vpow2.f32 %v431_v5  ;;  %v367_v18 = vpop.permute.xlu1 %366  ;;  %v363_v19 = vpop.permute.xlu0 %362  ;;  %v413_v21 = vmin.f32 %v953_v10, 0.0  ;;  %v414_v22 = vmin.f32 %v955_v11, 0.0  ;;  %vm400_vm6 = vcmp.gt.f32.partialorder %v951_v7, 0.0 }
  0xa9   : > { %715 = vpow2.f32 %v425_v8  ;;  %v437_v20 = vmul.f32 1.442695, %v415_v14  ;;  %v439_v25 = vmul.f32 1.442695, %v416_v17  ;;  %v961_v26 = vadd.f32 %v367_v18, %v291_v12 }
  0xaa   : > { %717 = vpow2.f32 %v427_v9  ;;  %v963_v23 = vadd.f32 %v367_v18, %v292_v13  ;;  %v433_v27 = vmul.f32 1.442695, %v413_v21  ;;  %v435_v24 = vmul.f32 1.442695, %v414_v22 }
  0xab   : > { %719 = vpow2.f32 %v437_v20  ;;  %v965_v28 = vadd.f32 %v363_v19, %v289_v15  ;;  %v419_v33 = vmin.f32 %v961_v26, 0.0  ;;  %v972_v37 = vadd.f32 %v363_v19, %v290_v16 }
  0xac   : > { %721 = vpow2.f32 %v439_v25  ;;  %v375_v34 = vpop.permute.xlu1 %374  ;;  %v420_v36 = vmin.f32 %v963_v23, 0.0  ;;  %v371_v31 = vpop.permute.xlu0 %370  ;;  %vm397_vm7 = vcmp.gt.f32.partialorder %v953_v10, 0.0  ;;  %vm398_vm8 = vcmp.gt.f32.partialorder %v955_v11, 0.0 }
  0xad   : > { %723 = vpow2.f32 %v433_v27  ;;  %v445_v38 = vmul.f32 1.442695, %v419_v33  ;;  %v417_v39 = vmin.f32 %v965_v28, 0.0  ;;  %v975_v40 = vadd.f32 %v375_v34, %v295_v29 }
  0xae   : > { %725 = vpow2.f32 %v435_v24  ;;  %v447_v42 = vmul.f32 1.442695, %v420_v36  ;;  %v418_v43 = vmin.f32 %v972_v37, 0.0  ;;  %v980_v44 = vadd.f32 %v375_v34, %v296_v35 }
  0xaf   : > { %727 = vpow2.f32 %v445_v38  ;;  %v441_v46 = vmul.f32 1.442695, %v417_v39  ;;  %v423_v47 = vmin.f32 %v975_v40, 0.0  ;;  %v987_v55 = vadd.f32 %v371_v31, %v293_v41 }
  0xb0   : > { %729 = vpow2.f32 %v447_v42  ;;  %v443_v48 = vmul.f32 1.442695, %v418_v43  ;;  %v424_v49 = vmin.f32 %v980_v44, 0.0  ;;  %v989_v56 = vadd.f32 %v371_v31, %v294_v45 }
  0xb1   : > { %731 = vpow2.f32 %v441_v46  ;;  %v453_v54 = vmul.f32 1.442695, %v423_v47  ;;  %v421_v32 = vmin.f32 %v987_v55, 0.0  ;;  %vm403_vm9 = vcmp.gt.f32.partialorder %v961_v26, 0.0 }
  0xb2   : > { %733 = vpow2.f32 %v443_v48  ;;  %v455_v57 = vmul.f32 1.442695, %v424_v49  ;;  %v422_v61 = vmin.f32 %v989_v56, 0.0  ;;  %vm404_vm10 = vcmp.gt.f32.partialorder %v963_v23, 0.0 }
  0xb3   : > { %735 = vpow2.f32 %v453_v54  ;;  %v449_v0 = vmul.f32 1.442695, %v421_v32  ;;  %vm401_vm11 = vcmp.gt.f32.partialorder %v965_v28, 0.0  ;;  %vm402_vm12 = vcmp.gt.f32.partialorder %v972_v37, 0.0 }
  0xb4   : > { %v712_v58 = vpop.eup %711  ;;  %737 = vpow2.f32 %v455_v57  ;;  %v451_v4 = vmul.f32 1.442695, %v422_v61  ;;  %vm407_vm13 = vcmp.gt.f32.partialorder %v975_v40, 0.0  ;;  %vm408_vm14 = vcmp.gt.f32.partialorder %v980_v44, 0.0 }
  0xb5   : > { %v714_v59 = vpop.eup %713  ;;  %v607_v60 = vadd.f32 -1.0, %v712_v58  ;;  %739 = vpow2.f32 %v449_v0  ;;  %vm405_vm15 = vcmp.gt.f32.partialorder %v987_v55, 0.0 }
  0xb6   : > { %v716_v62 = vpop.eup %715  ;;  %v608_v63 = vadd.f32 -1.0, %v714_v59  ;;  %741 = vpow2.f32 %v451_v4 }
  0xb7   : > { %v718_v1 = vpop.eup %717  ;;  %v475_v2 = vsel %vm395_vm1, %v936_v50, %v607_v60  ;;  %v605_v3 = vadd.f32 -1.0, %v716_v62  ;;  %vm406_vm1 = vcmp.gt.f32.partialorder %v989_v56, 0.0 }
  0xb8   : > { %v720_v5 = vpop.eup %719  ;;  %v476_v8 = vsel %vm396_vm2, %v938_v51, %v608_v63  ;;  %492 = vst.msk [vmem:[%s997_s27 + $0x10] sm:$0xff] %vm489_vm0, %v475_v2  ;;  %v606_v9 = vadd.f32 -1.0, %v718_v1 }
  0xb9   : > { %v722_v12 = vpop.eup %721  ;;  %493 = vst.msk [vmem:[%s997_s27 + $0x18] sm:$0xff] %vm489_vm0, %v476_v8  ;;  %v473_v50 = vsel %vm393_vm3, %v940_v52, %v605_v3  ;;  %v611_v51 = vadd.f32 -1.0, %v720_v5 }
  0xba   : > { %v724_v13 = vpop.eup %723  ;;  %v474_v14 = vsel %vm394_vm4, %v942_v53, %v606_v9  ;;  %490 = vst.msk [vmem:[%s997_s27] sm:$0xff] %vm489_vm0, %v473_v50  ;;  %v612_v15 = vadd.f32 -1.0, %v722_v12 }
  0xbb   : > { %v726_v16 = vpop.eup %725  ;;  %491 = vst.msk [vmem:[%s997_s27 + $0x8] sm:$0xff] %vm489_vm0, %v474_v14  ;;  %v479_v52 = vsel %vm399_vm5, %v949_v6, %v611_v51  ;;  %v609_v17 = vadd.f32 -1.0, %v724_v13 }
  0xbc   : > { %v480_v18 = vsel %vm400_vm6, %v951_v7, %v612_v15  ;;  %496 = vst.msk [vmem:[%s997_s27 + $0x30] sm:$0xff] %vm489_vm0, %v479_v52  ;;  %v610_v53 = vadd.f32 -1.0, %v726_v16  ;;  %v728_v19 = vpop.eup %727 }
  0xbd   : > { %497 = vst.msk [vmem:[%s997_s27 + $0x38] sm:$0xff] %vm489_vm0, %v480_v18  ;;  %v477_v20 = vsel %vm397_vm7, %v953_v10, %v609_v17  ;;  %v730_v21 = vpop.eup %729  ;;  %v615_v6 = vadd.f32 -1.0, %v728_v19 }
  0xbe   : > { %v478_v22 = vsel %vm398_vm8, %v955_v11, %v610_v53  ;;  %494 = vst.msk [vmem:[%s997_s27 + $0x20] sm:$0xff] %vm489_vm0, %v477_v20  ;;  %v732_v7 = vpop.eup %731  ;;  %v616_v25 = vadd.f32 -1.0, %v730_v21 }
  0xbf   : > { %495 = vst.msk [vmem:[%s997_s27 + $0x28] sm:$0xff] %vm489_vm0, %v478_v22  ;;  %v734_v27 = vpop.eup %733  ;;  %v483_v24 = vsel %vm403_vm9, %v961_v26, %v615_v6  ;;  %v613_v10 = vadd.f32 -1.0, %v732_v7 }
  0xc0   : > { %v736_v29 = vpop.eup %735  ;;  %v484_v11 = vsel %vm404_vm10, %v963_v23, %v616_v25  ;;  %500 = vst.msk [vmem:[%s997_s27 + $0x50] sm:$0xff] %vm489_vm0, %v483_v24  ;;  %v614_v30 = vadd.f32 -1.0, %v734_v27 }
  0xc1   : > { %v738_v33 = vpop.eup %737  ;;  %501 = vst.msk [vmem:[%s997_s27 + $0x58] sm:$0xff] %vm489_vm0, %v484_v11  ;;  %v481_v26 = vsel %vm401_vm11, %v965_v28, %v613_v10  ;;  %v619_v34 = vadd.f32 -1.0, %v736_v29 }
  0xc2   : > { %v482_v35 = vsel %vm402_vm12, %v972_v37, %v614_v30  ;;  %498 = vst.msk [vmem:[%s997_s27 + $0x40] sm:$0xff] %vm489_vm0, %v481_v26  ;;  %v620_v23 = vadd.f32 -1.0, %v738_v33  ;;  %v740_v28 = vpop.eup %739 }
  0xc3   : > { %499 = vst.msk [vmem:[%s997_s27 + $0x48] sm:$0xff] %vm489_vm0, %v482_v35  ;;  %v487_v36 = vsel %vm407_vm13, %v975_v40, %v619_v34  ;;  %v742_v37 = vpop.eup %741  ;;  %v617_v39 = vadd.f32 -1.0, %v740_v28 }
  0xc4   : > { %v488_v38 = vsel %vm408_vm14, %v980_v44, %v620_v23  ;;  %504 = vst.msk [vmem:[%s997_s27 + $0x70] sm:$0xff] %vm489_vm0, %v487_v36  ;;  %v618_v41 = vadd.f32 -1.0, %v742_v37 }
  0xc5   : > { %505 = vst.msk [vmem:[%s997_s27 + $0x78] sm:$0xff] %vm489_vm0, %v488_v38  ;;  %v485_v40 = vsel %vm405_vm15, %v987_v55, %v617_v39 }
  0xc6   : > { %v486_v42 = vsel %vm406_vm1, %v989_v56, %v618_v41  ;;  %502 = vst.msk [vmem:[%s997_s27 + $0x60] sm:$0xff] %vm489_vm0, %v485_v40 }
  0xc7   : > { %503 = vst.msk [vmem:[%s997_s27 + $0x68] sm:$0xff] %vm489_vm0, %v486_v42 }
  0xc8   : > { %756 = shalt.err (!%p753_p3)
}
  0xc9   : > { %s757_s10 = scalar_lea.hbm %s1057_s16, 2048  ;;  %s761_s19 = scalar_lea.hbm %s1113_s3, 4096 }
  0xca   : > { %p758_p4 = scmp.ne.s32.totalorder %s1057_s16, %s757_s10  ;;  %p762_p9 = scmp.lt.s32.totalorder %s1057_s16, %s1113_s3 }
  0xcb   : > { %p763_p10 = scmp.lt.s32.totalorder %s761_s19, %s757_s10 }
  0xcc   : > { %p759_p7 = pnand %p758_p4, %p867_p5 }
  0xcd   : > { %p764_p11 = por %p763_p10, %p762_p9 }
  0xce   : > { %p760_p8 = pneg %p759_p7 }
  0xd0   : > { %p765_p12 = pnand %p764_p11, %p760_p8 }
  0xd2   : > { %768 = shalt.err (!%p765_p12)
}
  0xd3   : > { %s807_s25 = smov 128   ;;  %s808_s26 = smov 8  }
  0xd4   : > { %667 = dma.vmem_to_hbm [thread:$0]  (%p867_p5), %s1059_s29, 2048, %s1057_s16, %s1070_s5, %s807_s25, %s807_s25, %s808_s26  }
  0xd5 PF: > { %p673_p13 = scmp.ge.s32.totalorder %s803_s15, 2  ;;  %s535_s27 = sand.u32 1, %s791_s12  }
  0xd6   : > { %s536_s28 = scalar_lea.sflag [#allocation3], %s535_s27 }
  0xd7   : > { %p670_p0 = pnand %p673_p13, %p871_p6 }
  0xd9   : > { %p671_p1 = pneg %p670_p0 }
  0xdb   : > { %786 = dma.done.wait (%p671_p1), %s536_s28, 2048  }
  0xdc   : > { %788 = vsyncadd (%p671_p1), %s536_s28, 4294965248  ;;  %p13_p2 = scmp.ge.s32.totalorder %s854_s18, 4   ;;  %s1116_s12 = smov %s795_s13 }
  0xdd   : > { %s1117_s13 = smov %s799_s14  ;;  %s1118_s14 = smov %s865_s21 }
  0xde   : > { %s1119_s15 = smov %s854_s18  ;;  %15 = sbr.rel (!%p13_p2) target bundleno = 3 (0x3), region = 67 }
  0xe3   :  { %541 = vsyncpa [#allocation3], 1 }
  0xe4   :  { %543 = vsyncpa [#allocation3 + $0x1], 1 }

// kernel: conv_block_forward.2
= control target key start
LH: loop header
LB: loop body
LE: loop exit
PB: predicated region body
PF: predicated region fallthrough
CT: control target
= control target key end

     0   :  { %s1657_s18 = smov 0   ;;  %s1864_s0 = inlined_call_operand.vmem [shape: bf16[2,8,384], index: 0, kind: input, shape index: {}]   ;;  %s1865_s1 = inlined_call_operand.vmem [shape: bf16[9,8,8], index: 1, kind: input, shape index: {}]   ;;  %s1866_s2 = inlined_call_operand.vmem [shape: f32[1,288], index: 2, kind: input, shape index: {}]   ;;  %s1867_s3 = inlined_call_operand.vmem [shape: bf16[2,8,288], index: 3, kind: output, shape index: {0}]   ;;  %s1868_s4 = inlined_call_operand.vmem [shape: f32[2,8,1], index: 4, kind: output, shape index: {1}]   ;;  %s1869_s5 = inlined_call_operand.vmem [shape: f32[2,8,1], index: 5, kind: output, shape index: {2}]  }
   0x1 LB: > { %s1420_s19 = sadd.s32 4294967295, %s1614_s18   ;;  %p1424_p0 = scmp.ge.s32.totalorder %s1614_s18, 1  ;;  %s1614_s18 = sphi %s1657_s18, %s16_s18  }
   0x2   : > { %p192_p1 = scmp.lt.s32.totalorder %s1614_s18, 3 }
   0x4   : > { %p193_p2 = pnand %p1424_p0, %p192_p1 }
   0x5   : > { %p228_p3 = scmp.lt.s32.totalorder (!%p193_p2), %s1420_s19, 1  ;;  %s1619_s24 = smov (!%p193_p2), 127  }
   0x6   : > { %196 = sbr.rel (%p193_p2) target bundleno = 702 (0x2be), region = 32  ;;  %s1620_s25 = smov (!%p193_p2), 126  }
   0x7   : > { %s1621_s26 = smov (!%p193_p2), 110   ;;  %s1622_s27 = smov (!%p193_p2), 109  }
   0x8   : > { %s1623_s28 = smov (!%p193_p2), 108   ;;  %s1624_s29 = smov (!%p193_p2), 92  }
   0x9   : > { %s1625_s30 = smov (!%p193_p2), 91   ;;  %s1626_s6 = smov (!%p193_p2), 90  }
   0xb   : > { %s1871_s19 = smov (!%p228_p3, %s1420_s19), 1  ;;  %v1616_v0 = vmov 0.0   ;;  %v1617_v4 = vmov 0   ;;  %vm1618_vm0 = vmmov 0   ;;  %v259_v8 = vlaneseq  ;;  %v1429_v30 = vld [vmem:[%s1865_s1 + $0x4] sm:$0xf] }
   0xc   : > { %s1545_s20 = smul.u32 12, %s1871_s19  ;;  %1491 = vmatprep.subr.bf16.mxu1 %v1616_v0  ;;  %316 = vmatprep.mubr.bf16.mxu0 %v1617_v4  ;;  %vm274_vm3 = vcmask 1043456   ;;  %vm270_vm4 = vcmask 64512   ;;  %v252_v43 = vld [vmem:[%s1865_s1] sm:$0xf]  ;;  %vm1301_vm11 = vcmask 257024  }
   0xd   : > { %1493 = vmatprep.mubr.msk.bf16.mxu1 %vm1618_vm0, %v1616_v0  ;;  %v1685_v9 = vand.u32 127, %v259_v8  ;;  %v1439_v56 = vld [vmem:[%s1865_s1 + $0x8] sm:$0xf]  ;;  %vm1264_vm12 = vcmask 261120   ;;  %vm1284_vm13 = vcmask 7168  }
   0xe   : > { %s232_s23 = scalar_lea.vmem %s1864_s0, %s1545_s20  ;;  %s237_s7 = scalar_lea.vmem %s1867_s3, %s1545_s20 }
   0xf   : > { %v1674_v1 = vld [vmem:[%s232_s23] sm:$0xff]  ;;  %v1681_v5 = vld [vmem:[%s232_s23 + $0x8] sm:$0xf]  ;;  %vm261_vm1 = vcmp.lt.s32.totalorder %v1685_v9, 127  ;;  %vm472_vm2 = vcmp.lt.s32.totalorder %v1685_v9, 126  ;;  %vm583_vm5 = vcmp.lt.s32.totalorder %v1685_v9, 110 }
  0x10   : > { %v249_v2 = vunpack.c.l.bf16 %v1674_v1  ;;  %v250_v3 = vunpack.c.h.bf16 %v1674_v1  ;;  %v251_v7 = vunpack.c.l.bf16 %v1681_v5  ;;  %v1434_v21 = vcombine.high %v1674_v1, %v1674_v1  ;;  %s1427_s20 = sshll.u32 %s1871_s19, 3 }
  0x11   : > { %v1433_v24 = vcombine.low %v1674_v1, %v1674_v1  ;;  %v1435_v25 = vcombine.low %v1681_v5, %v1681_v5  ;;  %vm694_vm6 = vcmp.lt.s32.totalorder %v1685_v9, 109  ;;  %vm805_vm7 = vcmp.lt.s32.totalorder %v1685_v9, 108  ;;  %s241_s10 = scalar_lea.vmem %s1868_s4, %s1427_s20  ;;  %s245_s12 = scalar_lea.vmem %s1869_s5, %s1427_s20 }
  0x12   : > { %v1565_v6 = vpack.i.bf16 %v250_v3, %v249_v2  ;;  %vm916_vm8 = vcmp.lt.s32.totalorder %v1685_v9, 92  ;;  %vm1027_vm9 = vcmp.lt.s32.totalorder %v1685_v9, 91  ;;  %vm1138_vm10 = vcmp.lt.s32.totalorder %v1685_v9, 90 }
  0x13   : > { %v377_v32 = vsel %vm274_vm3, %v1433_v24, 0  ;;  %v383_v34 = vsel %vm274_vm3, %v1435_v25, 0 }
  0x14   : > { %1566 = vrot.lane.b32.xlu0 %v1565_v6, %s1619_s24  ;;  %1571 = vrot.lane.b32.xlu1 %v1565_v6, %s1620_s25 }
  0x18   : > { %257 = vrot.lane.b32.xlu0 %v251_v7, %s1619_s24  ;;  %470 = vrot.lane.b32.xlu1 %v251_v7, %s1620_s25 }
  0x1c   : > { %1576 = vrot.lane.b32.xlu0 %v1565_v6, %s1621_s26  ;;  %581 = vrot.lane.b32.xlu1 %v251_v7, %s1621_s26 }
  0x20   : > { %1581 = vrot.lane.b32.xlu0 %v1565_v6, %s1622_s27  ;;  %692 = vrot.lane.b32.xlu1 %v251_v7, %s1622_s27 }
  0x24   : > { %1586 = vrot.lane.b32.xlu0 %v1565_v6, %s1623_s28  ;;  %803 = vrot.lane.b32.xlu1 %v251_v7, %s1623_s28 }
  0x28   : > { %1591 = vrot.lane.b32.xlu0 %v1565_v6, %s1624_s29  ;;  %914 = vrot.lane.b32.xlu1 %v251_v7, %s1624_s29 }
  0x2c   : > { %1596 = vrot.lane.b32.xlu0 %v1565_v6, %s1625_s30  ;;  %1025 = vrot.lane.b32.xlu1 %v251_v7, %s1625_s30 }
  0x30   : > { %1601 = vrot.lane.b32.xlu0 %v1565_v6, %s1626_s6  ;;  %1136 = vrot.lane.b32.xlu1 %v251_v7, %s1626_s6  ;;  %v1443_v7 = vld [vmem:[%s1865_s1 + $0xc] sm:$0xf] }
  0x86   : > { %v1567_v10 = vpop.permute.xlu0 %1566  ;;  %v1572_v11 = vpop.permute.xlu1 %1571 }
  0x87   : > { %v1569_v12 = vunpack.i.h.bf16 %v1567_v10  ;;  %v1568_v13 = vunpack.i.l.bf16 %v1567_v10  ;;  %v1574_v15 = vunpack.i.h.bf16 %v1572_v11  ;;  %v1573_v26 = vunpack.i.l.bf16 %v1572_v11 }
  0x89   : > { %v263_v14 = vsel %vm261_vm1, %v1568_v13, %v1569_v12  ;;  %v474_v36 = vsel %vm472_vm2, %v1573_v26, %v1574_v15 }
  0x8a   : > { %v258_v16 = vpop.permute.xlu0 %257  ;;  %v267_v17 = vpack.c.bf16 %v263_v14, %v263_v14  ;;  %v471_v18 = vpop.permute.xlu1 %470  ;;  %v478_v40 = vpack.c.bf16 %v474_v36, %v474_v36 }
  0x8b   : > { %v264_v19 = vsel %vm261_vm1, %v258_v16, %v1568_v13  ;;  %v262_v20 = vsel %vm261_vm1, %v1569_v12, %v258_v16  ;;  %v473_v27 = vsel %vm472_vm2, %v1574_v15, %v471_v18  ;;  %v475_v35 = vsel %vm472_vm2, %v471_v18, %v1573_v26 }
  0x8c   : > { %v269_v22 = vpack.c.bf16 %v264_v19, %v264_v19  ;;  %v268_v23 = vpack.c.bf16 %v262_v20, %v262_v20  ;;  %v276_v28 = vsel %vm274_vm3, %v267_v17, 0  ;;  %v479_v33 = vpack.c.bf16 %v473_v27, %v473_v27 }
  0x8d   : > { %v480_v39 = vpack.c.bf16 %v475_v35, %v475_v35  ;;  %v485_v45 = vsel %vm274_vm3, %v478_v40, 0  ;;  %v1451_v35 = vld [vmem:[%s1865_s1 + $0x14] sm:$0xf] }
  0x8e   : > { %1430 = vmatprep.subr.msk.bf16.mxu0 %vm274_vm3, %v268_v23  ;;  %v282_v29 = vsel %vm274_vm3, %v269_v22, 0  ;;  %v1577_v31 = vpop.permute.xlu0 %1576  ;;  %v582_v38 = vpop.permute.xlu1 %581  ;;  %v1447_v22 = vld [vmem:[%s1865_s1 + $0x10] sm:$0xf] }
  0x8f   : > { %299 = vmatpush1.bf16.msra.mxu0 %v276_v28  ;;  %1492 = vmatpush3.bf16.msra.mxu1 %v282_v29  ;;  %v1579_v37 = vunpack.i.h.bf16 %v1577_v31  ;;  %v1578_v41 = vunpack.i.l.bf16 %v1577_v31  ;;  %v491_v46 = vsel %vm274_vm3, %v480_v39, 0 }
  0x90   : > { %1436 = vmatprep.subr.msk.bf16.mxu0 %vm274_vm3, %v1434_v21  ;;  %1497 = vmatprep.subr.bf16.mxu1 %v1616_v0 }
  0x91   : > { %v584_v42 = vsel %vm583_vm5, %v1579_v37, %v582_v38  ;;  %v586_v47 = vsel %vm583_vm5, %v582_v38, %v1578_v41  ;;  %v585_v49 = vsel %vm583_vm5, %v1578_v41, %v1579_v37 }
  0x92   : > { %1431 = vmatmul.mubr.msk.bf16.vlgmr.msra.gmra.mxu0 %vm270_vm4, %v1429_v30  ;;  %1494 = vmatmul.mubr.msk.bf16.vlgmr.msra.gmra.mxu1 %vm270_vm4, %v1429_v30  ;;  %v1582_v44 = vpop.permute.xlu0 %1581  ;;  %v590_v48 = vpack.c.bf16 %v584_v42, %v584_v42  ;;  %v693_v51 = vpop.permute.xlu1 %692  ;;  %v591_v52 = vpack.c.bf16 %v586_v47, %v586_v47  ;;  %v589_v53 = vpack.c.bf16 %v585_v49, %v585_v49 }
  0x93   : > { %400 = vmatpush1.bf16.msra.mxu0 %v377_v32  ;;  %1498 = vmatpush3.bf16.msra.mxu1 %v383_v34  ;;  %v1584_v50 = vunpack.i.h.bf16 %v1582_v44  ;;  %v1583_v54 = vunpack.i.l.bf16 %v1582_v44 }
  0x94   : > { %1440 = vmatprep.subr.msk.bf16.mxu0 %vm274_vm3, %v479_v33  ;;  %417 = vmatprep.mubr.bf16.mxu0 %v1617_v4  ;;  %v596_v58 = vsel %vm274_vm3, %v589_v53, 0  ;;  %v602_v59 = vsel %vm274_vm3, %v591_v52, 0 }
  0x95   : > { %1499 = vmatprep.mubr.msk.bf16.mxu1 %vm1618_vm0, %v1616_v0  ;;  %1503 = vmatprep.subr.bf16.mxu1 %v1616_v0  ;;  %v695_v55 = vsel %vm694_vm6, %v1584_v50, %v693_v51  ;;  %v697_v60 = vsel %vm694_vm6, %v693_v51, %v1583_v54  ;;  %v696_v62 = vsel %vm694_vm6, %v1583_v54, %v1584_v50 }
  0x96   : > { %v1587_v57 = vpop.permute.xlu0 %1586  ;;  %v701_v61 = vpack.c.bf16 %v695_v55, %v695_v55  ;;  %v804_v1 = vpop.permute.xlu1 %803  ;;  %v702_v2 = vpack.c.bf16 %v697_v60, %v697_v60  ;;  %v700_v3 = vpack.c.bf16 %v696_v62, %v696_v62  ;;  %v1459_v55 = vld [vmem:[%s1865_s1 + $0x1c] sm:$0xf] }
  0x97   : > { %v1589_v63 = vunpack.i.h.bf16 %v1587_v57  ;;  %v1588_v5 = vunpack.i.l.bf16 %v1587_v57 }
  0x98   : > { %v707_v11 = vsel %vm274_vm3, %v700_v3, 0  ;;  %v713_v12 = vsel %vm274_vm3, %v702_v2, 0 }
  0x99   : > { %v806_v6 = vsel %vm805_vm7, %v1589_v63, %v804_v1  ;;  %v808_v13 = vsel %vm805_vm7, %v804_v1, %v1588_v5  ;;  %v807_v15 = vsel %vm805_vm7, %v1588_v5, %v1589_v63 }
  0x9a   : > { %1437 = vmatmul.mubr.msk.bf16.vlgmr.msra.gmra.mxu0 %vm270_vm4, %v252_v43  ;;  %1500 = vmatmul.mubr.msk.bf16.vlgmr.msra.gmra.mxu1 %vm270_vm4, %v252_v43  ;;  %v1592_v10 = vpop.permute.xlu0 %1591  ;;  %v812_v14 = vpack.c.bf16 %v806_v6, %v806_v6  ;;  %v915_v17 = vpop.permute.xlu1 %914  ;;  %v813_v18 = vpack.c.bf16 %v808_v13, %v808_v13  ;;  %v811_v19 = vpack.c.bf16 %v807_v15, %v807_v15 }
  0x9b   : > { %508 = vmatpush1.bf16.msra.mxu0 %v485_v45  ;;  %1504 = vmatpush3.bf16.msra.mxu1 %v491_v46  ;;  %v1594_v16 = vunpack.i.h.bf16 %v1592_v10  ;;  %v1593_v20 = vunpack.i.l.bf16 %v1592_v10 }
  0x9c   : > { %525 = vmatprep.mubr.bf16.mxu0 %v1617_v4  ;;  %1505 = vmatprep.mubr.msk.bf16.mxu1 %vm1618_vm0, %v1616_v0  ;;  %v818_v24 = vsel %vm274_vm3, %v811_v19, 0  ;;  %v824_v25 = vsel %vm274_vm3, %v813_v18, 0 }
  0x9d   : > { %1444 = vmatprep.subr.msk.bf16.mxu0 %vm274_vm3, %v590_v48  ;;  %1509 = vmatprep.subr.bf16.mxu1 %v1616_v0  ;;  %v917_v21 = vsel %vm916_vm8, %v1594_v16, %v915_v17  ;;  %v919_v26 = vsel %vm916_vm8, %v915_v17, %v1593_v20  ;;  %v918_v28 = vsel %vm916_vm8, %v1593_v20, %v1594_v16  ;;  %v1455_v48 = vld [vmem:[%s1865_s1 + $0x18] sm:$0xf] }
  0x9e   : > { %v1597_v23 = vpop.permute.xlu0 %1596  ;;  %v923_v27 = vpack.c.bf16 %v917_v21, %v917_v21  ;;  %v1026_v30 = vpop.permute.xlu1 %1025  ;;  %v924_v31 = vpack.c.bf16 %v919_v26, %v919_v26  ;;  %v922_v32 = vpack.c.bf16 %v918_v28, %v918_v28 }
  0x9f   : > { %v1599_v29 = vunpack.i.h.bf16 %v1597_v23  ;;  %v1598_v33 = vunpack.i.l.bf16 %v1597_v23 }
  0xa0   : > { %v929_v37 = vsel %vm274_vm3, %v922_v32, 0  ;;  %v935_v38 = vsel %vm274_vm3, %v924_v31, 0 }
  0xa1   : > { %v1028_v34 = vsel %vm1027_vm9, %v1599_v29, %v1026_v30  ;;  %v1030_v39 = vsel %vm1027_vm9, %v1026_v30, %v1598_v33  ;;  %v1029_v41 = vsel %vm1027_vm9, %v1598_v33, %v1599_v29 }
  0xa2   : > { %1441 = vmatmul.mubr.msk.bf16.vlgmr.msra.gmra.mxu0 %vm270_vm4, %v1439_v56  ;;  %1506 = vmatmul.mubr.msk.bf16.vlgmr.msra.gmra.mxu1 %vm270_vm4, %v1439_v56  ;;  %v1602_v36 = vpop.permute.xlu0 %1601  ;;  %v1034_v40 = vpack.c.bf16 %v1028_v34, %v1028_v34  ;;  %v1137_v43 = vpop.permute.xlu1 %1136  ;;  %v1035_v44 = vpack.c.bf16 %v1030_v39, %v1030_v39  ;;  %v1033_v45 = vpack.c.bf16 %v1029_v41, %v1029_v41 }
  0xa3   : > { %619 = vmatpush1.bf16.msra.mxu0 %v596_v58  ;;  %1510 = vmatpush3.bf16.msra.mxu1 %v602_v59  ;;  %v1604_v42 = vunpack.i.h.bf16 %v1602_v36  ;;  %v1603_v46 = vunpack.i.l.bf16 %v1602_v36  ;;  %v1463_v58 = vld [vmem:[%s1865_s1 + $0x20] sm:$0xf] }
  0xa4   : > { %636 = vmatprep.mubr.bf16.mxu0 %v1617_v4  ;;  %1511 = vmatprep.mubr.msk.bf16.mxu1 %vm1618_vm0, %v1616_v0  ;;  %v1040_v9 = vsel %vm274_vm3, %v1033_v45, 0  ;;  %v1046_v49 = vsel %vm274_vm3, %v1035_v44, 0 }
  0xa5   : > { %1448 = vmatprep.subr.msk.bf16.mxu0 %vm274_vm3, %v701_v61  ;;  %1515 = vmatprep.subr.bf16.mxu1 %v1616_v0  ;;  %v1139_v47 = vsel %vm1138_vm10, %v1604_v42, %v1137_v43  ;;  %v1141_v50 = vsel %vm1138_vm10, %v1137_v43, %v1603_v46  ;;  %v1140_v52 = vsel %vm1138_vm10, %v1603_v46, %v1604_v42 }
  0xa6   : > { %v1145_v51 = vpack.c.bf16 %v1139_v47, %v1139_v47  ;;  %v1146_v53 = vpack.c.bf16 %v1141_v50, %v1141_v50  ;;  %v1144_v54 = vpack.c.bf16 %v1140_v52, %v1140_v52 }
  0xa8   : > { %v1151_v56 = vsel %vm274_vm3, %v1144_v54, 0  ;;  %v1157_v57 = vsel %vm274_vm3, %v1146_v53, 0 }
  0xaa   : > { %1445 = vmatmul.mubr.msk.bf16.vlgmr.msra.gmra.mxu0 %vm270_vm4, %v1443_v7  ;;  %1512 = vmatmul.mubr.msk.bf16.vlgmr.msra.gmra.mxu1 %vm270_vm4, %v1443_v7 }
  0xab   : > { %730 = vmatpush1.bf16.msra.mxu0 %v707_v11  ;;  %1516 = vmatpush3.bf16.msra.mxu1 %v713_v12 }
  0xac   : > { %747 = vmatprep.mubr.bf16.mxu0 %v1617_v4  ;;  %1517 = vmatprep.mubr.msk.bf16.mxu1 %vm1618_vm0, %v1616_v0 }
  0xad   : > { %1452 = vmatprep.subr.msk.bf16.mxu0 %vm274_vm3, %v812_v14  ;;  %1521 = vmatprep.subr.bf16.mxu1 %v1616_v0 }
  0xb2   : > { %1449 = vmatmul.mubr.msk.bf16.vlgmr.msra.gmra.mxu0 %vm270_vm4, %v1447_v22  ;;  %1518 = vmatmul.mubr.msk.bf16.vlgmr.msra.gmra.mxu1 %vm270_vm4, %v1447_v22 }
  0xb3   : > { %841 = vmatpush1.bf16.msra.mxu0 %v818_v24  ;;  %1522 = vmatpush3.bf16.msra.mxu1 %v824_v25 }
  0xb4   : > { %858 = vmatprep.mubr.bf16.mxu0 %v1617_v4  ;;  %1523 = vmatprep.mubr.msk.bf16.mxu1 %vm1618_vm0, %v1616_v0 }
  0xb5   : > { %1456 = vmatprep.subr.msk.bf16.mxu0 %vm274_vm3, %v923_v27  ;;  %1527 = vmatprep.subr.bf16.mxu1 %v1616_v0 }
  0xba   : > { %1453 = vmatmul.mubr.msk.bf16.vlgmr.msra.gmra.mxu0 %vm270_vm4, %v1451_v35  ;;  %1524 = vmatmul.mubr.msk.bf16.vlgmr.msra.gmra.mxu1 %vm270_vm4, %v1451_v35 }
  0xbb   : > { %952 = vmatpush1.bf16.msra.mxu0 %v929_v37  ;;  %1528 = vmatpush3.bf16.msra.mxu1 %v935_v38 }
  0xbc   : > { %969 = vmatprep.mubr.bf16.mxu0 %v1617_v4  ;;  %1529 = vmatprep.mubr.msk.bf16.mxu1 %vm1618_vm0, %v1616_v0 }
  0xbd   : > { %1460 = vmatprep.subr.msk.bf16.mxu0 %vm274_vm3, %v1034_v40  ;;  %1533 = vmatprep.subr.bf16.mxu1 %v1616_v0 }
  0xc2   : > { %1457 = vmatmul.mubr.msk.bf16.vlgmr.msra.gmra.mxu0 %vm270_vm4, %v1455_v48  ;;  %1530 = vmatmul.mubr.msk.bf16.vlgmr.msra.gmra.mxu1 %vm270_vm4, %v1455_v48 }
  0xc3   : > { %1063 = vmatpush1.bf16.msra.mxu0 %v1040_v9  ;;  %1534 = vmatpush3.bf16.msra.mxu1 %v1046_v49 }
  0xc4   : > { %1080 = vmatprep.mubr.bf16.mxu0 %v1617_v4  ;;  %1535 = vmatprep.mubr.msk.bf16.mxu1 %vm1618_vm0, %v1616_v0 }
  0xc5   : > { %1464 = vmatprep.subr.msk.bf16.mxu0 %vm274_vm3, %v1145_v51  ;;  %1539 = vmatprep.subr.bf16.mxu1 %v1616_v0 }
  0xca   : > { %1461 = vmatmul.mubr.msk.bf16.vlgmr.msra.gmra.mxu0 %vm270_vm4, %v1459_v55  ;;  %1536 = vmatmul.mubr.msk.bf16.vlgmr.msra.gmra.mxu1 %vm270_vm4, %v1459_v55 }
  0xcb   : > { %1174 = vmatpush1.bf16.msra.mxu0 %v1151_v56  ;;  %1540 = vmatpush3.bf16.msra.mxu1 %v1157_v57 }
  0xcc   : > { %1191 = vmatprep.mubr.bf16.mxu0 %v1617_v4  ;;  %1541 = vmatprep.mubr.msk.bf16.mxu1 %vm1618_vm0, %v1616_v0 }
  0xd2   : > { %1465 = vmatmul.mubr.msk.bf16.vlgmr.msra.gmra.mxu0 %vm270_vm4, %v1463_v58  ;;  %1542 = vmatmul.mubr.msk.bf16.vlgmr.msra.gmra.mxu1 %vm270_vm4, %v1463_v58 }
 0x152   : > { %v318_v59 = vpop.f32.mrf.mxu0  ;;  %v359_v60 = vpop.f32.mrf.mxu1 }
 0x154   : > { %v320_v61 = vpop.f32.mrf.mxu0  ;;  %v1495_v62 = vpop.f32.mrf.mxu1 }
 0x156   : > { %v322_v63 = vpop.f32.mrf.mxu0  ;;  %v362_v1 = vpop.f32.mrf.mxu1 }
 0x158   : > { %v323_v2 = vpop.f32.mrf.mxu0  ;;  %v1496_v3 = vpop.f32.mrf.mxu1 }
 0x159   : > { %v1246_v2 = vshrl.u32 %v259_v8, 7  ;;  %v1243_v8 = vld [vmem:[%s1866_s2] sm:$0x7] }
 0x15a   : > { %v419_v4 = vpop.f32.mrf.mxu0  ;;  %v460_v5 = vpop.f32.mrf.mxu1 }
 0x15b   : > { %v420_v9 = vadd.f32 %v419_v4, %v318_v59  ;;  %v461_v49 = vadd.f32 %v460_v5, %v359_v60 }
 0x15c   : > { %v421_v6 = vpop.f32.mrf.mxu0  ;;  %v1501_v0 = vpop.f32.mrf.mxu1 }
 0x15d   : > { %v422_v52 = vadd.f32 %v421_v6, %v320_v61 }
 0x15e   : > { %v423_v7 = vpop.f32.mrf.mxu0  ;;  %v463_v10 = vpop.f32.mrf.mxu1 }
 0x160   : > { %v424_v11 = vpop.f32.mrf.mxu0  ;;  %v1502_v12 = vpop.f32.mrf.mxu1 }
 0x161   : > { %v1247_v11 = vsub.s32 0, %v1246_v2  ;;  %v1255_v12 = vsub.s32 2, %v1246_v2 }
 0x162   : > { %v527_v13 = vpop.f32.mrf.mxu0  ;;  %v568_v14 = vpop.f32.mrf.mxu1 }
 0x163   : > { %v574_v53 = vadd.f32 %v527_v13, %v420_v9  ;;  %v576_v54 = vadd.f32 %v568_v14, %v461_v49 }
 0x164   : > { %v529_v15 = vpop.f32.mrf.mxu0  ;;  %v1507_v16 = vpop.f32.mrf.mxu1 }
 0x165   : > { %v575_v57 = vadd.f32 %v529_v15, %v422_v52  ;;  %v1251_v16 = vsub.s32 1, %v1246_v2 }
 0x166   : > { %v531_v17 = vpop.f32.mrf.mxu0  ;;  %v571_v18 = vpop.f32.mrf.mxu1 }
 0x168   : > { %v532_v19 = vpop.f32.mrf.mxu0  ;;  %v1508_v20 = vpop.f32.mrf.mxu1 }
 0x16a   : > { %v638_v21 = vpop.f32.mrf.mxu0  ;;  %v679_v22 = vpop.f32.mrf.mxu1 }
 0x16b   : > { %v685_v58 = vadd.f32 %v638_v21, %v574_v53  ;;  %v687_v62 = vadd.f32 %v679_v22, %v576_v54 }
 0x16c   : > { %v640_v23 = vpop.f32.mrf.mxu0  ;;  %v1513_v24 = vpop.f32.mrf.mxu1 }
 0x16d   : > { %v686_v3 = vadd.f32 %v640_v23, %v575_v57  ;;  %v1248_v23 = vrot.slane %v1243_v8, %v1247_v11 }
 0x16e   : > { %v642_v25 = vpop.f32.mrf.mxu0  ;;  %v682_v26 = vpop.f32.mrf.mxu1 }
 0x16f   : > { %v1256_v25 = vrot.slane %v1243_v8, %v1255_v12 }
 0x170   : > { %v643_v27 = vpop.f32.mrf.mxu0  ;;  %v1514_v28 = vpop.f32.mrf.mxu1 }
 0x172   : > { %v749_v29 = vpop.f32.mrf.mxu0  ;;  %v790_v30 = vpop.f32.mrf.mxu1 }
 0x173   : > { %v796_v0 = vadd.f32 %v749_v29, %v685_v58  ;;  %v798_v7 = vadd.f32 %v790_v30, %v687_v62  ;;  %v1252_v29 = vrot.slane %v1243_v8, %v1251_v16 }
 0x174   : > { %v751_v31 = vpop.f32.mrf.mxu0  ;;  %v1519_v32 = vpop.f32.mrf.mxu1 }
 0x175   : > { %v797_v60 = vadd.f32 %v751_v31, %v686_v3 }
 0x176   : > { %v753_v33 = vpop.f32.mrf.mxu0  ;;  %v793_v34 = vpop.f32.mrf.mxu1 }
 0x178   : > { %v754_v35 = vpop.f32.mrf.mxu0  ;;  %v1520_v36 = vpop.f32.mrf.mxu1 }
 0x17a   : > { %v860_v37 = vpop.f32.mrf.mxu0  ;;  %v901_v38 = vpop.f32.mrf.mxu1 }
 0x17b   : > { %v907_v4 = vadd.f32 %v860_v37, %v796_v0  ;;  %v909_v5 = vadd.f32 %v901_v38, %v798_v7 }
 0x17c   : > { %v862_v39 = vpop.f32.mrf.mxu0  ;;  %v1525_v40 = vpop.f32.mrf.mxu1 }
 0x17d   : > { %v908_v13 = vadd.f32 %v862_v39, %v797_v60 }
 0x17e   : > { %v864_v41 = vpop.f32.mrf.mxu0  ;;  %v904_v42 = vpop.f32.mrf.mxu1 }
 0x180   : > { %v865_v43 = vpop.f32.mrf.mxu0  ;;  %v1526_v44 = vpop.f32.mrf.mxu1 }
 0x182   : > { %v971_v45 = vpop.f32.mrf.mxu0  ;;  %v1012_v46 = vpop.f32.mrf.mxu1 }
 0x183   : > { %v1018_v14 = vadd.f32 %v971_v45, %v907_v4  ;;  %v1020_v15 = vadd.f32 %v1012_v46, %v909_v5 }
 0x184   : > { %v973_v47 = vpop.f32.mrf.mxu0  ;;  %v1531_v48 = vpop.f32.mrf.mxu1 }
 0x185   : > { %v1019_v19 = vadd.f32 %v973_v47, %v908_v13 }
 0x186   : > { %v975_v50 = vpop.f32.mrf.mxu0  ;;  %v1015_v51 = vpop.f32.mrf.mxu1 }
 0x188   : > { %v976_v55 = vpop.f32.mrf.mxu0  ;;  %v1532_v56 = vpop.f32.mrf.mxu1 }
 0x18a   : > { %v1082_v63 = vpop.f32.mrf.mxu0  ;;  %v1123_v1 = vpop.f32.mrf.mxu1 }
 0x18b   : > { %v1129_v20 = vadd.f32 %v1082_v63, %v1018_v14  ;;  %v1131_v21 = vadd.f32 %v1123_v1, %v1020_v15 }
 0x18c   : > { %v1084_v10 = vpop.f32.mrf.mxu0  ;;  %v1537_v59 = vpop.f32.mrf.mxu1 }
 0x18d   : > { %v1130_v26 = vadd.f32 %v1084_v10, %v1019_v19 }
 0x18e   : > { %v1086_v61 = vpop.f32.mrf.mxu0  ;;  %v1126_v6 = vpop.f32.mrf.mxu1 }
 0x190   : > { %v1087_v17 = vpop.f32.mrf.mxu0  ;;  %v1538_v18 = vpop.f32.mrf.mxu1 }
 0x192   : > { %v1193_v22 = vpop.f32.mrf.mxu0  ;;  %v1234_v24 = vpop.f32.mrf.mxu1 }
 0x193   : > { %v1240_v27 = vadd.f32 %v1193_v22, %v1129_v20  ;;  %v1242_v28 = vadd.f32 %v1234_v24, %v1131_v21 }
 0x194   : > { %v1195_v30 = vpop.f32.mrf.mxu0  ;;  %v1543_v31 = vpop.f32.mrf.mxu1 }
 0x195   : > { %v1472_v32 = vpack.c.bf16 %v1242_v28, %v1242_v28  ;;  %v1241_v33 = vadd.f32 %v1195_v30, %v1130_v26  ;;  %v1262_v36 = vmul.f32 %v1256_v25, %v1242_v28  ;;  %v1260_v37 = vmul.f32 %v1248_v23, %v1240_v27 }
 0x196   : > { %v1197_v34 = vpop.f32.mrf.mxu0  ;;  %v1237_v35 = vpop.f32.mrf.mxu1 }
 0x197   : > { %v1261_v38 = vmul.f32 %v1252_v29, %v1241_v33  ;;  %v1471_v39 = vpack.c.bf16 %v1241_v33, %v1240_v27  ;;  %1302 = vst.msk [vmem:[%s237_s7 + $0x8] sm:$0xf] %vm1301_vm11, %v1472_v32  ;;  %v1265_v43 = vsel %vm1264_vm12, %v1262_v36, 0.0 }
 0x198   : > { %v1198_v40 = vpop.f32.mrf.mxu0  ;;  %v1544_v41 = vpop.f32.mrf.mxu1 }
 0x199   : > { %1300 = vst [vmem:[%s237_s7] sm:$0xff] %v1471_v39  ;;  %v1263_v42 = vadd.f32 %v1261_v38, %v1260_v37 }
 0x19b   : > { %v1266_v44 = vadd.f32 %v1265_v43, %v1263_v42 }
 0x19d   : > { %1267 = vadd.xlane.f32.xlu0 %v1266_v44 }
 0x226   : > { %v1268_v45 = vpop.xlane.xlu0 %1267 }
 0x227   : > { %v1269_v46 = vmul.f32 0.00390625, %v1268_v45 }
 0x229   : > { %v1270_v47 = vsub.f32 %v1240_v27, %v1269_v46  ;;  %v1271_v48 = vsub.f32 %v1241_v33, %v1269_v46  ;;  %v1272_v9 = vsub.f32 %v1242_v28, %v1269_v46  ;;  %1285 = vst.msk [vmem:[%s241_s10] sm:$0xff] %vm1284_vm13, %v1269_v46 }
 0x22b   : > { %v1273_v49 = vmul.f32 %v1270_v47, %v1248_v23  ;;  %v1274_v50 = vmul.f32 %v1271_v48, %v1252_v29  ;;  %v1275_v51 = vmul.f32 %v1272_v9, %v1256_v25 }
 0x22d   : > { %v1276_v52 = vmul.f32 %v1273_v49, %v1273_v49  ;;  %v1277_v53 = vmul.f32 %v1274_v50, %v1274_v50  ;;  %v1278_v54 = vmul.f32 %v1275_v51, %v1275_v51 }
 0x22f   : > { %v1279_v55 = vadd.f32 %v1277_v53, %v1276_v52  ;;  %v1280_v56 = vsel %vm1264_vm12, %v1278_v54, 0.0 }
 0x231   : > { %v1281_v57 = vadd.f32 %v1280_v56, %v1279_v55 }
 0x233   : > { %1282 = vadd.xlane.f32.xlu1 %v1281_v57 }
 0x2bc   : > { %v1283_v58 = vpop.xlane.xlu1 %1282 }
 0x2bd   : > { %1286 = vst.msk [vmem:[%s245_s12] sm:$0xff] %vm1284_vm13, %v1283_v58 }
 0x2be PF: > { %s16_s18 = sadd.s32 1, %s1614_s18  }
 0x2bf   : > { %p13_p4 = scmp.ge.s32.totalorder %s16_s18, 4  }
 0x2c1   :  { %15 = sbr.rel (!%p13_p4) target bundleno = 1 (0x1), region = 94 }

</bundles_post_ra>
